<compile_context>
chip_gen: v5e
topology: v5e:2x2
jax: 0.10.0
libtpu: 0.0.40
codegen_flags: <defaults>
</compile_context>

<pallas_src>
import functools

import jax
import jax.numpy as jnp
from jax import lax
from jax.experimental import pallas as pl
from jax.experimental.pallas import tpu as pltpu

LANE = 128


def _round_up(x, m):
    return (x + m - 1) // m * m


def _inverted_residual_kernel(
    xa_ref, xc_ref, xb_ref,                 # bf16: halo row above, tile, halo row below
    w1_ref, b1_ref, wdw_ref, b2_ref, w3_ref, b3_ref,
    o_ref,
    *, tile_h, W, use_res,
):
    rows = tile_h * W                        # output rows of this tile (i = h*W + w)
    rows_ext = rows + 2 * W                  # + one full image row of halo on each side

    # ---- assemble the halo'd input slab (bf16, lane-dense) -------------------
    x_tile = xc_ref[0]                                               # (rows, Cp)
    x_ext = jnp.concatenate([xa_ref[0], x_tile, xb_ref[0]], axis=0)  # (rows_ext, Cp)

    # ---- stage 1: 1x1 expand conv (BN folded) + bias + ReLU ------------------
    # bf16 x bf16 -> f32 accumulation on the MXU.
    t1 = jnp.dot(x_ext, w1_ref[...], preferred_element_type=jnp.float32)
    t1 = jnp.maximum(t1 + b1_ref[0, :], 0.0)                         # (rows_ext, Hp)

    # Halo rows that fall outside the image implement the depthwise conv's zero
    # padding: zero them *after* the expand (padding lives in the t1 domain).
    t = pl.program_id(1)
    idx = lax.broadcasted_iota(jnp.int32, (rows_ext, 1), 0)
    top_ok = jnp.logical_or(idx >= W, t > 0)
    bot_ok = jnp.logical_or(idx < rows_ext - W, t < pl.num_programs(1) - 1)
    t1 = jnp.where(jnp.logical_and(top_ok, bot_ok), t1, 0.0)

    # ---- stage 2: 3x3 depthwise conv (BN folded), stride 1, zero padding -----
    #   * +-1 column shift -> pltpu.roll (XLU) + left/right edge mask
    #   * +-1 row shift    -> static sublane-aligned slices of the halo'd slab
    if (W & (W - 1)) == 0:                   # W power of two: modulo == AND
        col = jnp.bitwise_and(idx, W - 1)
    else:
        col = lax.rem(idx, W)
    not_left = col != 0
    not_right = col != (W - 1)

    x_l = jnp.where(not_left, pltpu.roll(t1, 1, axis=0), 0.0)              # t1[h, w-1]
    x_r = jnp.where(not_right, pltpu.roll(t1, rows_ext - 1, axis=0), 0.0)  # t1[h, w+1]

    k = wdw_ref[...]                         # (9, Hp) f32, row index = dy*3 + dx
    row_top = x_l * k[0] + t1 * k[1] + x_r * k[2]   # dy=-1 taps at source row h-1
    row_mid = x_l * k[3] + t1 * k[4] + x_r * k[5]   # dy= 0 taps at source row h
    row_bot = x_l * k[6] + t1 * k[7] + x_r * k[8]   # dy=+1 taps at source row h+1

    # Output tile row i sits at extended index i + W.
    acc = row_top[:rows] + row_mid[W:W + rows] + row_bot[2 * W:2 * W + rows]
    t2 = jnp.maximum(acc + b2_ref[0, :], 0.0)       # (rows, Hp) f32

    # ---- stage 3: 1x1 project conv (BN folded; conv has no bias) -------------
    out = jnp.dot(t2.astype(jnp.bfloat16), w3_ref[...],
                  preferred_element_type=jnp.float32)
    out = out + b3_ref[0, :]

    # ---- stage 4: residual connection -----------------------------------------
    if use_res:
        out = out + x_tile.astype(jnp.float32)

    o_ref[0] = out.astype(o_ref.dtype)


def _fold_and_pad_params(params, in_channels):
    """Fold BN scales into conv weights; zero-pad channel dims to LANE width.

    1x1 weights are stored bf16 (MXU inputs); depthwise taps and biases stay
    f32 (that chain runs in f32)."""
    w1, s1, b1 = params["w1"], params["s1"], params["b1"]
    wdw, s2, b2 = params["wdw"], params["s2"], params["b2"]
    w3, s3, b3 = params["w3"], params["s3"], params["b3"]
    hidden = w1.shape[1]
    out_channels = w3.shape[1]
    cp = _round_up(in_channels, LANE)
    hp = _round_up(hidden, LANE)
    op = _round_up(out_channels, LANE)

    def pad(a, shape):
        return jnp.pad(a, [(0, t - s) for s, t in zip(a.shape, shape)])

    folded = {
        "w1": pad(w1 * s1, (cp, hp)).astype(jnp.bfloat16),
        "b1": pad(b1, (1, hp)),
        "wdw": pad(wdw * s2, (9, hp)),
        "b2": pad(b2, (1, hp)),
        "w3": pad(w3 * s3, (hp, op)).astype(jnp.bfloat16),
        "b3": pad(b3, (1, op)),
    }
    return folded, cp, hp, op, hidden, out_channels


def _pick_tile_h(H, W, Hp, *, target_rows=2048, vmem_budget_bytes=24 << 20):
    """Largest row tile (divisor of H) whose ~8 live (rows_ext, Hp) f32
    temporaries stay under a conservative budget sized for v7x (64 MiB/TC);
    v5e/v6e (128 MiB) get the same comfortable tile.  For bigger tiles on
    v5e/v6e, also raise pltpu.CompilerParams(vmem_limit_bytes=...)."""
    best = 1
    for th in range(1, H + 1):
        if H % th:
            continue
        rows = th * W
        footprint = 8 * (rows + 2 * W) * Hp * 4
        if rows <= target_rows and footprint <= vmem_budget_bytes:
            best = th
    return best


def inverted_residual_pallas(x_nchw, params, *, stride=1, tile_h=None):
    """x_nchw: (N, Cin, H, W) float32.  params: dict from make_params."""
    assert stride == 1, "only stride=1 implemented (see TODO)"
    N, Cin, H, W = x_nchw.shape
    assert W % 8 == 0, "W must be a multiple of 8 (sublane) for this layout"
    p, Cp, Hp, Op, _, Cout = _fold_and_pad_params(params, Cin)
    use_res = (stride == 1) and (Cin == Cout)
    HW = H * W

    if tile_h is None:
        tile_h = _pick_tile_h(H, W, Hp)
    assert H % tile_h == 0, "tile_h must divide H"
    num_tiles = H // tile_h
    rows = tile_h * W

    # NCHW -> (N, H*W, C): channel dim zero-padded to a full lane width,
    # activations crossing HBM as bf16.
    x = jnp.transpose(x_nchw, (0, 2, 3, 1)).reshape(N, HW, Cin)
    x = jnp.pad(x, ((0, 0), (0, 0), (0, Cp - Cin))).astype(jnp.bfloat16)

    kernel = functools.partial(
        _inverted_residual_kernel, tile_h=tile_h, W=W, use_res=use_res)

    # Halo rows: one full image row above / below the tile; the index is
    # clamped at the image edges and the kernel zeroes those rows.
    def above_map(n, t):
        return (n, jnp.maximum(t * tile_h - 1, 0), 0)

    def tile_map(n, t):
        return (n, t, 0)

    def below_map(n, t):
        return (n, jnp.minimum((t + 1) * tile_h, H - 1), 0)

    wfull = lambda n, t: (0, 0)

    out = pl.pallas_call(
        kernel,
        out_shape=jax.ShapeDtypeStruct((N, HW, Op), jnp.bfloat16),
        grid_spec=pltpu.PrefetchScalarGridSpec(
            num_scalar_prefetch=0,
            grid=(N, num_tiles),
            in_specs=[
                pl.BlockSpec((1, W, Cp), above_map),     # halo row above
                pl.BlockSpec((1, rows, Cp), tile_map),   # current row tile
                pl.BlockSpec((1, W, Cp), below_map),     # halo row below
                pl.BlockSpec((Cp, Hp), wfull),           # w1 (BN folded, bf16)
                pl.BlockSpec((1, Hp), wfull),            # b1
                pl.BlockSpec((9, Hp), wfull),            # depthwise taps (folded)
                pl.BlockSpec((1, Hp), wfull),            # b2
                pl.BlockSpec((Hp, Op), wfull),           # w3 (BN folded, bf16)
                pl.BlockSpec((1, Op), wfull),            # b3
            ],
            out_specs=pl.BlockSpec((1, rows, Op), tile_map),
        ),
        compiler_params=pltpu.CompilerParams(
            dimension_semantics=("parallel", "parallel"),
        ),
    )(x, x, x, p["w1"], p["b1"], p["wdw"], p["b2"], p["w3"], p["b3"])

    out = out[:, :, :Cout].astype(jnp.float32).reshape(N, H, W, Cout)
    return jnp.transpose(out, (0, 3, 1, 2))              # back to NCHW


def make_params(key, in_channels, out_channels, expand_ratio=2):
    """Deterministic synthetic parameters; BN folded to scale/bias (eval mode)."""
    hidden = int(in_channels * expand_ratio)
    eps = 1e-5
    ks = jax.random.split(key, 17)

    def bn_fold(kw, kb, km, kv, conv_bias, c):
        gamma = 1.0 + 0.1 * jax.random.normal(kw, (c,), jnp.float32)
        beta = 0.1 * jax.random.normal(kb, (c,), jnp.float32)
        mean = 0.1 * jax.random.normal(km, (c,), jnp.float32)
        var = jnp.abs(jax.random.normal(kv, (c,), jnp.float32)) + 0.5
        scale = gamma / jnp.sqrt(var + eps)
        bias = scale * (conv_bias - mean) + beta
        return scale, bias

    # conv1: 1x1, in->hidden, with bias
    w1 = 0.3 * jax.random.normal(ks[0], (in_channels, hidden), jnp.float32)
    bc1 = 0.1 * jax.random.normal(ks[1], (hidden,), jnp.float32)
    s1, b1 = bn_fold(ks[2], ks[3], ks[4], ks[5], bc1, hidden)

    # conv2: 3x3 depthwise, hidden->hidden, with bias
    wdw = 0.3 * jax.random.normal(ks[6], (3, 3, hidden), jnp.float32)
    bc2 = 0.1 * jax.random.normal(ks[7], (hidden,), jnp.float32)
    s2, b2 = bn_fold(ks[8], ks[9], ks[10], ks[11], bc2, hidden)

    # conv3: 1x1, hidden->out, no bias
    w3 = 0.3 * jax.random.normal(ks[12], (hidden, out_channels), jnp.float32)
    s3, b3 = bn_fold(ks[13], ks[14], ks[15], ks[16],
                     jnp.zeros((out_channels,), jnp.float32), out_channels)

    return {
        "w1": w1, "s1": s1.reshape(1, -1), "b1": b1.reshape(1, -1),
        "wdw": wdw.reshape(9, hidden),
        "s2": s2.reshape(1, -1), "b2": b2.reshape(1, -1),
        "w3": w3, "s3": s3.reshape(1, -1), "b3": b3.reshape(1, -1),
    }


def ref_forward(x_nchw, params, *, stride=1):
    """Pure-JAX f32 reference (matches the PyTorch module in eval mode)."""
    N, Cin, H, W = x_nchw.shape
    x = jnp.transpose(x_nchw, (0, 2, 3, 1))
    w1 = params["w1"]; Hd = w1.shape[1]
    w3 = params["w3"]; Cout = w3.shape[1]

    t1 = jax.nn.relu(jnp.einsum("nhwc,cd->nhwd", x, w1)
                     * params["s1"][0] + params["b1"][0])
    wdw = params["wdw"].reshape(3, 3, 1, Hd)              # HWIO, depthwise
    t2 = lax.conv_general_dilated(
        t1, wdw, window_strides=(stride, stride), padding="SAME",
        dimension_numbers=("NHWC", "HWIO", "NHWC"), feature_group_count=Hd)
    t2 = jax.nn.relu(t2 * params["s2"][0] + params["b2"][0])
    t3 = (jnp.einsum("nhwc,cd->nhwd", t2, w3)
          * params["s3"][0] + params["b3"][0])
    if stride == 1 and Cin == Cout:
        t3 = t3 + x
    return jnp.transpose(t3, (0, 3, 1, 2))


if __name__ == "__main__":
    key = jax.random.PRNGKey(0)
    kx, kp = jax.random.split(key)

    N, Cin, H, W = 2, 4, 16, 16
    Cout, expand_ratio, stride = 4, 2, 1

    x = jax.random.normal(kx, (N, Cin, H, W), jnp.float32)
    params = make_params(kp, Cin, Cout, expand_ratio)

    ref = jax.block_until_ready(ref_forward(x, params, stride=stride))

    # bf16 activations / matmul inputs (f32 accumulation) => re-baselined
    # tolerance vs. the old all-f32 kernel.
    tol = dict(atol=5e-2, rtol=5e-2)

    # Auto-sized row tile (whole image per step at this demo size).
    out = jax.block_until_ready(inverted_residual_pallas(x, params, stride=stride))
    assert out.shape == (N, Cout, H, W)
    assert jnp.allclose(out, ref, **tol), float(jnp.max(jnp.abs(out - ref)))

    # Force several row tiles per image to exercise the halo / tiling path.
    out_t = jax.block_until_ready(
        inverted_residual_pallas(x, params, stride=stride, tile_h=4))
    assert jnp.allclose(out_t, ref, **tol), float(jnp.max(jnp.abs(out_t - ref)))

    print("KERNEL_OK")
</pallas_src>

<mosaic_0001>
module attributes {stable_mosaic.version = 11 : i64} {
  func.func @_inverted_residual_kernel(%arg0: i32, %arg1: i32, %arg2: memref<1x16x128xbf16, #tpu.memory_space<vmem>>, %arg3: memref<1x256x128xbf16, #tpu.memory_space<vmem>>, %arg4: memref<1x16x128xbf16, #tpu.memory_space<vmem>>, %arg5: memref<128x128xbf16, #tpu.memory_space<vmem>>, %arg6: memref<1x128xf32, #tpu.memory_space<vmem>>, %arg7: memref<9x128xf32, #tpu.memory_space<vmem>>, %arg8: memref<1x128xf32, #tpu.memory_space<vmem>>, %arg9: memref<128x128xbf16, #tpu.memory_space<vmem>>, %arg10: memref<1x128xf32, #tpu.memory_space<vmem>>, %arg11: memref<1x256x128xbf16, #tpu.memory_space<vmem>>) attributes {dimension_semantics = [#tpu.dimension_semantics<parallel>, #tpu.dimension_semantics<parallel>], iteration_bounds = array<i64: 2, 1>, scalar_prefetch = 0 : i64, scratch_operands = 0 : i64, tpu.core_type = #tpu.core_type<tc>, window_params = [{transform_indices = @transform_0, window_bounds = array<i64: 1, 16, 128>}, {transform_indices = @transform_1, window_bounds = array<i64: 1, 256, 128>}, {transform_indices = @transform_2, window_bounds = array<i64: 1, 16, 128>}, {pipeline_mode = #tpu.pipeline_mode<synchronous>, transform_indices = @transform_3, window_bounds = array<i64: 128, 128>}, {pipeline_mode = #tpu.pipeline_mode<synchronous>, transform_indices = @transform_4, window_bounds = array<i64: 1, 128>}, {pipeline_mode = #tpu.pipeline_mode<synchronous>, transform_indices = @transform_5, window_bounds = array<i64: 9, 128>}, {pipeline_mode = #tpu.pipeline_mode<synchronous>, transform_indices = @transform_6, window_bounds = array<i64: 1, 128>}, {pipeline_mode = #tpu.pipeline_mode<synchronous>, transform_indices = @transform_7, window_bounds = array<i64: 128, 128>}, {pipeline_mode = #tpu.pipeline_mode<synchronous>, transform_indices = @transform_8, window_bounds = array<i64: 1, 128>}, {transform_indices = @transform_9, window_bounds = array<i64: 1, 256, 128>}]} {
    %c0 = arith.constant 0 : index
    %c0_0 = arith.constant 0 : index
    %c0_1 = arith.constant 0 : index
    %0 = vector.load %arg3[%c0, %c0_0, %c0_1] : memref<1x256x128xbf16, #tpu.memory_space<vmem>>, vector<1x256x128xbf16>
    %1 = vector.shape_cast %0 : vector<1x256x128xbf16> to vector<256x128xbf16>
    %c0_2 = arith.constant 0 : index
    %c0_3 = arith.constant 0 : index
    %c0_4 = arith.constant 0 : index
    %2 = vector.load %arg2[%c0_2, %c0_3, %c0_4] : memref<1x16x128xbf16, #tpu.memory_space<vmem>>, vector<1x16x128xbf16>
    %3 = vector.shape_cast %2 : vector<1x16x128xbf16> to vector<16x128xbf16>
    %c0_5 = arith.constant 0 : index
    %c0_6 = arith.constant 0 : index
    %c0_7 = arith.constant 0 : index
    %4 = vector.load %arg4[%c0_5, %c0_6, %c0_7] : memref<1x16x128xbf16, #tpu.memory_space<vmem>>, vector<1x16x128xbf16>
    %5 = vector.shape_cast %4 : vector<1x16x128xbf16> to vector<16x128xbf16>
    %6 = tpu.concatenate %3, %1, %5 in 0 : vector<16x128xbf16>, vector<256x128xbf16>, vector<16x128xbf16> -> vector<288x128xbf16>
    %c0_8 = arith.constant 0 : index
    %c0_9 = arith.constant 0 : index
    %7 = vector.load %arg5[%c0_8, %c0_9] : memref<128x128xbf16, #tpu.memory_space<vmem>>, vector<128x128xbf16>
    %cst = arith.constant dense<0.000000e+00> : vector<288x128xf32>
    %8 = tpu.matmul %6, %7, %cst {dimension_numbers = #tpu.dot_dimension_numbers<[1], [0], [0], [1], [0, 0, 1, 1], [], []>} : vector<288x128xbf16>, vector<128x128xbf16>, vector<288x128xf32> -> vector<288x128xf32>
    %c0_10 = arith.constant 0 : index
    %c0_11 = arith.constant 0 : index
    %9 = vector.load %arg6[%c0_10, %c0_11] : memref<1x128xf32, #tpu.memory_space<vmem>>, vector<1x128xf32>
    %10 = vector.shape_cast %9 : vector<1x128xf32> to vector<128xf32>
    %11 = vector.shape_cast %10 : vector<128xf32> to vector<1x128xf32>
    %12 = vector.broadcast %11 : vector<1x128xf32> to vector<288x128xf32>
    %13 = arith.addf %8, %12 : vector<288x128xf32>
    %cst_12 = arith.constant 0.000000e+00 : f32
    %14 = vector.broadcast %cst_12 : f32 to vector<288x128xf32>
    %15 = arith.maximumf %13, %14 : vector<288x128xf32>
    %16 = tpu.iota {dimensions = array<i32: 0>} : vector<288x1xi32>
    %c16_i32 = arith.constant 16 : i32
    %17 = vector.broadcast %c16_i32 : i32 to vector<288x1xi32>
    %18 = arith.cmpi sge, %16, %17 : vector<288x1xi32>
    %c0_i32 = arith.constant 0 : i32
    %19 = arith.cmpi sgt, %arg1, %c0_i32 : i32
    %20 = vector.broadcast %19 : i1 to vector<288x1xi1>
    %21 = arith.ori %18, %20 : vector<288x1xi1>
    %c272_i32 = arith.constant 272 : i32
    %22 = vector.broadcast %c272_i32 : i32 to vector<288x1xi32>
    %23 = arith.cmpi slt, %16, %22 : vector<288x1xi32>
    %c0_i32_13 = arith.constant 0 : i32
    %24 = arith.cmpi slt, %arg1, %c0_i32_13 : i32
    %25 = vector.broadcast %24 : i1 to vector<288x1xi1>
    %26 = arith.ori %23, %25 : vector<288x1xi1>
    %27 = arith.andi %21, %26 : vector<288x1xi1>
    %cst_14 = arith.constant 0.000000e+00 : f32
    %28 = vector.shape_cast %27 : vector<288x1xi1> to vector<288x1xi1>
    %29 = vector.broadcast %28 : vector<288x1xi1> to vector<288x128xi1>
    %30 = vector.broadcast %cst_14 : f32 to vector<288x128xf32>
    %31 = arith.select %29, %15, %30 : vector<288x128xi1>, vector<288x128xf32>
    %c15_i32 = arith.constant 15 : i32
    %32 = vector.broadcast %c15_i32 : i32 to vector<288x1xi32>
    %33 = arith.andi %16, %32 : vector<288x1xi32>
    %c0_i32_15 = arith.constant 0 : i32
    %34 = vector.broadcast %c0_i32_15 : i32 to vector<288x1xi32>
    %35 = arith.cmpi ne, %33, %34 : vector<288x1xi32>
    %c15_i32_16 = arith.constant 15 : i32
    %36 = vector.broadcast %c15_i32_16 : i32 to vector<288x1xi32>
    %37 = arith.cmpi ne, %33, %36 : vector<288x1xi32>
    %c1_i32 = arith.constant 1 : i32
    %38 = tpu.dynamic_rotate %31 by %c1_i32 dim 0 : vector<288x128xf32>, i32 -> vector<288x128xf32>
    %cst_17 = arith.constant 0.000000e+00 : f32
    %39 = vector.shape_cast %35 : vector<288x1xi1> to vector<288x1xi1>
    %40 = vector.broadcast %39 : vector<288x1xi1> to vector<288x128xi1>
    %41 = vector.broadcast %cst_17 : f32 to vector<288x128xf32>
    %42 = arith.select %40, %38, %41 : vector<288x128xi1>, vector<288x128xf32>
    %c287_i32 = arith.constant 287 : i32
    %43 = tpu.dynamic_rotate %31 by %c287_i32 dim 0 : vector<288x128xf32>, i32 -> vector<288x128xf32>
    %cst_18 = arith.constant 0.000000e+00 : f32
    %44 = vector.shape_cast %37 : vector<288x1xi1> to vector<288x1xi1>
    %45 = vector.broadcast %44 : vector<288x1xi1> to vector<288x128xi1>
    %46 = vector.broadcast %cst_18 : f32 to vector<288x128xf32>
    %47 = arith.select %45, %43, %46 : vector<288x128xi1>, vector<288x128xf32>
    %c0_19 = arith.constant 0 : index
    %c0_20 = arith.constant 0 : index
    %48 = vector.load %arg7[%c0_19, %c0_20] : memref<9x128xf32, #tpu.memory_space<vmem>>, vector<9x128xf32>
    %49 = vector.extract_strided_slice %48 {offsets = [0, 0], sizes = [1, 128], strides = [1, 1]} : vector<9x128xf32> to vector<1x128xf32>
    %50 = vector.shape_cast %49 : vector<1x128xf32> to vector<128xf32>
    %51 = vector.shape_cast %50 : vector<128xf32> to vector<1x128xf32>
    %52 = vector.broadcast %51 : vector<1x128xf32> to vector<288x128xf32>
    %53 = arith.mulf %42, %52 : vector<288x128xf32>
    %54 = vector.extract_strided_slice %48 {offsets = [1, 0], sizes = [1, 128], strides = [1, 1]} : vector<9x128xf32> to vector<1x128xf32>
    %55 = vector.shape_cast %54 : vector<1x128xf32> to vector<128xf32>
    %56 = vector.shape_cast %55 : vector<128xf32> to vector<1x128xf32>
    %57 = vector.broadcast %56 : vector<1x128xf32> to vector<288x128xf32>
    %58 = arith.mulf %31, %57 : vector<288x128xf32>
    %59 = arith.addf %53, %58 : vector<288x128xf32>
    %60 = vector.extract_strided_slice %48 {offsets = [2, 0], sizes = [1, 128], strides = [1, 1]} : vector<9x128xf32> to vector<1x128xf32>
    %61 = vector.shape_cast %60 : vector<1x128xf32> to vector<128xf32>
    %62 = vector.shape_cast %61 : vector<128xf32> to vector<1x128xf32>
    %63 = vector.broadcast %62 : vector<1x128xf32> to vector<288x128xf32>
    %64 = arith.mulf %47, %63 : vector<288x128xf32>
    %65 = arith.addf %59, %64 : vector<288x128xf32>
    %66 = vector.extract_strided_slice %48 {offsets = [3, 0], sizes = [1, 128], strides = [1, 1]} : vector<9x128xf32> to vector<1x128xf32>
    %67 = vector.shape_cast %66 : vector<1x128xf32> to vector<128xf32>
    %68 = vector.shape_cast %67 : vector<128xf32> to vector<1x128xf32>
    %69 = vector.broadcast %68 : vector<1x128xf32> to vector<288x128xf32>
    %70 = arith.mulf %42, %69 : vector<288x128xf32>
    %71 = vector.extract_strided_slice %48 {offsets = [4, 0], sizes = [1, 128], strides = [1, 1]} : vector<9x128xf32> to vector<1x128xf32>
    %72 = vector.shape_cast %71 : vector<1x128xf32> to vector<128xf32>
    %73 = vector.shape_cast %72 : vector<128xf32> to vector<1x128xf32>
    %74 = vector.broadcast %73 : vector<1x128xf32> to vector<288x128xf32>
    %75 = arith.mulf %31, %74 : vector<288x128xf32>
    %76 = arith.addf %70, %75 : vector<288x128xf32>
    %77 = vector.extract_strided_slice %48 {offsets = [5, 0], sizes = [1, 128], strides = [1, 1]} : vector<9x128xf32> to vector<1x128xf32>
    %78 = vector.shape_cast %77 : vector<1x128xf32> to vector<128xf32>
    %79 = vector.shape_cast %78 : vector<128xf32> to vector<1x128xf32>
    %80 = vector.broadcast %79 : vector<1x128xf32> to vector<288x128xf32>
    %81 = arith.mulf %47, %80 : vector<288x128xf32>
    %82 = arith.addf %76, %81 : vector<288x128xf32>
    %83 = vector.extract_strided_slice %48 {offsets = [6, 0], sizes = [1, 128], strides = [1, 1]} : vector<9x128xf32> to vector<1x128xf32>
    %84 = vector.shape_cast %83 : vector<1x128xf32> to vector<128xf32>
    %85 = vector.shape_cast %84 : vector<128xf32> to vector<1x128xf32>
    %86 = vector.broadcast %85 : vector<1x128xf32> to vector<288x128xf32>
    %87 = arith.mulf %42, %86 : vector<288x128xf32>
    %88 = vector.extract_strided_slice %48 {offsets = [7, 0], sizes = [1, 128], strides = [1, 1]} : vector<9x128xf32> to vector<1x128xf32>
    %89 = vector.shape_cast %88 : vector<1x128xf32> to vector<128xf32>
    %90 = vector.shape_cast %89 : vector<128xf32> to vector<1x128xf32>
    %91 = vector.broadcast %90 : vector<1x128xf32> to vector<288x128xf32>
    %92 = arith.mulf %31, %91 : vector<288x128xf32>
    %93 = arith.addf %87, %92 : vector<288x128xf32>
    %94 = vector.extract_strided_slice %48 {offsets = [8, 0], sizes = [1, 128], strides = [1, 1]} : vector<9x128xf32> to vector<1x128xf32>
    %95 = vector.shape_cast %94 : vector<1x128xf32> to vector<128xf32>
    %96 = vector.shape_cast %95 : vector<128xf32> to vector<1x128xf32>
    %97 = vector.broadcast %96 : vector<1x128xf32> to vector<288x128xf32>
    %98 = arith.mulf %47, %97 : vector<288x128xf32>
    %99 = arith.addf %93, %98 : vector<288x128xf32>
    %100 = vector.extract_strided_slice %65 {offsets = [0, 0], sizes = [256, 128], strides = [1, 1]} : vector<288x128xf32> to vector<256x128xf32>
    %101 = vector.extract_strided_slice %82 {offsets = [16, 0], sizes = [256, 128], strides = [1, 1]} : vector<288x128xf32> to vector<256x128xf32>
    %102 = arith.addf %100, %101 : vector<256x128xf32>
    %103 = vector.extract_strided_slice %99 {offsets = [32, 0], sizes = [256, 128], strides = [1, 1]} : vector<288x128xf32> to vector<256x128xf32>
    %104 = arith.addf %102, %103 : vector<256x128xf32>
    %c0_21 = arith.constant 0 : index
    %c0_22 = arith.constant 0 : index
    %105 = vector.load %arg8[%c0_21, %c0_22] : memref<1x128xf32, #tpu.memory_space<vmem>>, vector<1x128xf32>
    %106 = vector.shape_cast %105 : vector<1x128xf32> to vector<128xf32>
    %107 = vector.shape_cast %106 : vector<128xf32> to vector<1x128xf32>
    %108 = vector.broadcast %107 : vector<1x128xf32> to vector<256x128xf32>
    %109 = arith.addf %104, %108 : vector<256x128xf32>
    %cst_23 = arith.constant 0.000000e+00 : f32
    %110 = vector.broadcast %cst_23 : f32 to vector<256x128xf32>
    %111 = arith.maximumf %109, %110 : vector<256x128xf32>
    %112 = arith.truncf %111 : vector<256x128xf32> to vector<256x128xbf16>
    %c0_24 = arith.constant 0 : index
    %c0_25 = arith.constant 0 : index
    %113 = vector.load %arg9[%c0_24, %c0_25] : memref<128x128xbf16, #tpu.memory_space<vmem>>, vector<128x128xbf16>
    %cst_26 = arith.constant dense<0.000000e+00> : vector<256x128xf32>
    %114 = tpu.matmul %112, %113, %cst_26 {dimension_numbers = #tpu.dot_dimension_numbers<[1], [0], [0], [1], [0, 0, 1, 1], [], []>} : vector<256x128xbf16>, vector<128x128xbf16>, vector<256x128xf32> -> vector<256x128xf32>
    %c0_27 = arith.constant 0 : index
    %c0_28 = arith.constant 0 : index
    %115 = vector.load %arg10[%c0_27, %c0_28] : memref<1x128xf32, #tpu.memory_space<vmem>>, vector<1x128xf32>
    %116 = vector.shape_cast %115 : vector<1x128xf32> to vector<128xf32>
    %117 = vector.shape_cast %116 : vector<128xf32> to vector<1x128xf32>
    %118 = vector.broadcast %117 : vector<1x128xf32> to vector<256x128xf32>
    %119 = arith.addf %114, %118 : vector<256x128xf32>
    %120 = arith.extf %1 : vector<256x128xbf16> to vector<256x128xf32>
    %121 = arith.addf %119, %120 : vector<256x128xf32>
    %122 = arith.truncf %121 : vector<256x128xf32> to vector<256x128xbf16>
    %c0_29 = arith.constant 0 : index
    %c0_30 = arith.constant 0 : index
    %c0_31 = arith.constant 0 : index
    %123 = vector.load %arg11[%c0_29, %c0_30, %c0_31] : memref<1x256x128xbf16, #tpu.memory_space<vmem>>, vector<1x256x128xbf16>
    %124 = vector.shape_cast %123 : vector<1x256x128xbf16> to vector<256x128xbf16>
    %125 = vector.shape_cast %122 : vector<256x128xbf16> to vector<1x256x128xbf16>
    tpu.vector_store %arg11[%c0_29, %c0_30, %c0_31], %125 {strides = array<i32>} : memref<1x256x128xbf16, #tpu.memory_space<vmem>>, vector<1x256x128xbf16>,
    return
  }
  func.func @transform_0(%arg0: i32, %arg1: i32) -> (i32, i32, i32) {
    %c16_i32 = arith.constant 16 : i32
    %0 = arith.muli %arg1, %c16_i32 : i32
    %c1_i32 = arith.constant 1 : i32
    %1 = arith.subi %0, %c1_i32 : i32
    %c0_i32 = arith.constant 0 : i32
    %2 = arith.maxsi %1, %c0_i32 : i32
    %c0_i32_0 = arith.constant 0 : i32
    %c0_i32_1 = arith.constant 0 : i32
    return %arg0, %2, %c0_i32_0 : i32, i32, i32
  }
  func.func @transform_1(%arg0: i32, %arg1: i32) -> (i32, i32, i32) {
    %c0_i32 = arith.constant 0 : i32
    %c0_i32_0 = arith.constant 0 : i32
    return %arg0, %arg1, %c0_i32 : i32, i32, i32
  }
  func.func @transform_2(%arg0: i32, %arg1: i32) -> (i32, i32, i32) {
    %c1_i32 = arith.constant 1 : i32
    %0 = arith.addi %arg1, %c1_i32 : i32
    %c16_i32 = arith.constant 16 : i32
    %1 = arith.muli %0, %c16_i32 : i32
    %c15_i32 = arith.constant 15 : i32
    %2 = arith.minsi %1, %c15_i32 : i32
    %c0_i32 = arith.constant 0 : i32
    %c0_i32_0 = arith.constant 0 : i32
    return %arg0, %2, %c0_i32 : i32, i32, i32
  }
  func.func @transform_3(%arg0: i32, %arg1: i32) -> (i32, i32) {
    %c0_i32 = arith.constant 0 : i32
    %c0_i32_0 = arith.constant 0 : i32
    %c0_i32_1 = arith.constant 0 : i32
    return %c0_i32, %c0_i32_0 : i32, i32
  }
  func.func @transform_4(%arg0: i32, %arg1: i32) -> (i32, i32) {
    %c0_i32 = arith.constant 0 : i32
    %c0_i32_0 = arith.constant 0 : i32
    %c0_i32_1 = arith.constant 0 : i32
    return %c0_i32, %c0_i32_0 : i32, i32
  }
  func.func @transform_5(%arg0: i32, %arg1: i32) -> (i32, i32) {
    %c0_i32 = arith.constant 0 : i32
    %c0_i32_0 = arith.constant 0 : i32
    %c0_i32_1 = arith.constant 0 : i32
    return %c0_i32, %c0_i32_0 : i32, i32
  }
  func.func @transform_6(%arg0: i32, %arg1: i32) -> (i32, i32) {
    %c0_i32 = arith.constant 0 : i32
    %c0_i32_0 = arith.constant 0 : i32
    %c0_i32_1 = arith.constant 0 : i32
    return %c0_i32, %c0_i32_0 : i32, i32
  }
  func.func @transform_7(%arg0: i32, %arg1: i32) -> (i32, i32) {
    %c0_i32 = arith.constant 0 : i32
    %c0_i32_0 = arith.constant 0 : i32
    %c0_i32_1 = arith.constant 0 : i32
    return %c0_i32, %c0_i32_0 : i32, i32
  }
  func.func @transform_8(%arg0: i32, %arg1: i32) -> (i32, i32) {
    %c0_i32 = arith.constant 0 : i32
    %c0_i32_0 = arith.constant 0 : i32
    %c0_i32_1 = arith.constant 0 : i32
    return %c0_i32, %c0_i32_0 : i32, i32
  }
  func.func @transform_9(%arg0: i32, %arg1: i32) -> (i32, i32, i32) {
    %c0_i32 = arith.constant 0 : i32
    %c0_i32_0 = arith.constant 0 : i32
    return %arg0, %arg1, %c0_i32 : i32, i32, i32
  }
}

</mosaic_0001>

<bundles_post_ra>
// kernel: tpu_custom_call.1
= control target key start
LH: loop header
LB: loop body
LE: loop exit
PB: predicated region body
PF: predicated region fallthrough
CT: control target
= control target key end

     0   :  { %s5472_s0 = inlined_call_operand.hbm [shape: bf16[2,256,128], index: 0, kind: input, shape index: {}]   ;;  %s5473_s1 = inlined_call_operand.hbm [shape: bf16[2,256,128], index: 1, kind: input, shape index: {}]   ;;  %s5474_s2 = inlined_call_operand.hbm [shape: bf16[2,256,128], index: 2, kind: input, shape index: {}]   ;;  %s5475_s3 = inlined_call_operand.hbm [shape: bf16[128,128], index: 3, kind: input, shape index: {}]   ;;  %s5476_s4 = inlined_call_operand.vmem [shape: f32[1,128], index: 4, kind: input, shape index: {}]   ;;  %s5477_s5 = inlined_call_operand.hbm [shape: f32[9,128], index: 5, kind: input, shape index: {}]   ;;  %s5478_s6 = inlined_call_operand.vmem [shape: f32[1,128], index: 6, kind: input, shape index: {}]   ;;  %s5479_s7 = inlined_call_operand.hbm [shape: bf16[128,128], index: 7, kind: input, shape index: {}]   ;;  %s5480_s8 = inlined_call_operand.vmem [shape: f32[1,128], index: 8, kind: input, shape index: {}]   ;;  %s5481_s9 = inlined_call_operand.hbm [shape: bf16[2,256,128], index: 9, kind: output, shape index: {}]  }
   0x1   :  { %5531 = sst [smem:[#allocation77_spill]] %s5473_s1 }
   0x2   :  { %5532 = sst [smem:[#allocation78_spill]] %s5475_s3 }
   0x3   :  { %5533 = sst [smem:[#allocation79_spill]] %s5477_s5 }
   0x4   :  { %5534 = sst [smem:[#allocation80_spill]] %s5479_s7 }
   0x5   :  { %5535 = sst [smem:[#allocation81_spill]] %s5481_s9 }
   0x6   :  { %14 = vsyncpa [#allocation3], 0 }
   0x7   :  { %16 = vsyncpa [#allocation3 + $0x1], 0 }
   0x8   :  { %17 = vsyncpa [#allocation6], 0 }
   0x9   :  { %19 = vsyncpa [#allocation6 + $0x1], 0 }
   0xa   :  { %20 = vsyncpa [#allocation9], 0 }
   0xb   :  { %21 = vsyncpa [#allocation12], 0 }
   0xc   :  { %22 = vsyncpa [#allocation4], 0 }
   0xd   :  { %24 = vsyncpa [#allocation4 + $0x1], 0  ;;  %s3572_s30 = smov 0   ;;  %s3574_s10 = smov 0  }
   0xe   :  { %s3576_s11 = smov 0   ;;  %s3578_s12 = smov 0  }
   0xf   :  { %s3580_s13 = smov 0   ;;  %s3582_s14 = smov 0  }
  0x10 LB: > { %5536 = sst [smem:[#allocation19_spill]] %s3490_s30  ;;  %s3603_s15 = sadd.s32 4294967295, %s3510_s14   ;;  %s3510_s14 = sphi %s3582_s14, %s30_s14   ;;  %s3506_s13 = sphi %s3580_s13, %s5796_s13   ;;  %s3502_s12 = sphi %s3578_s12, %s5795_s12   ;;  %s3498_s11 = sphi %s3576_s11, %s5794_s11   ;;  %s3494_s10 = sphi %s3574_s10, %s5798_s10   ;;  %s3490_s30 = sphi %s3572_s30, %s5797_s30  }
  0x11   : > { %5537 = sst [smem:[#allocation20_spill]] %s3498_s11  ;;  %s2804_s16 = sadd.s32 4294967294, %s3510_s14  }
  0x12   : > { %5538 = sst [smem:[#allocation21_spill]] %s3502_s12  ;;  %p72_p0 = scmp.ne.s32.totalorder %s3494_s10, %s3490_s30 }
  0x13   : > { %5539 = sst [smem:[#allocation22_spill]] %s3506_s13  ;;  %p73_p1 = scmp.eq.s32.totalorder %s3603_s15, 0 }
  0x14   : > { %p288_p2 = scmp.eq.s32.totalorder %s3603_s15, 1  ;;  %p294_p3 = scmp.eq.s32.totalorder %s2804_s16, 1 }
  0x15   : > { %p3612_p4 = por %p73_p1, %p72_p0  ;;  %p2805_p5 = scmp.ge.s32.totalorder %s3510_s14, 1 }
  0x16   : > { %p3617_p6 = por %p294_p3, %p72_p0  ;;  %p301_p7 = scmp.lt.s32.totalorder %s3510_s14, 3 }
  0x17   : > { %s5543_s3 = sld [smem:[#allocation78_spill]]  ;;  %s3512_s23 = smov [#allocation8]  }
  0x18   : > { %s5541_s18 = scalar_select %p3617_p6, 1, 0 }
  0x19   : > { %p3625_p8 = pnand %p2805_p5, %p301_p7  ;;  %s314_s24 = sshll.u32 %s3512_s23, 4  ;;  %s315_s24 = int_to_ptr.vmem [resolvable:$true] %s314_s24 }
  0x1a   : > { %5542 = sst [smem:[#allocation23_spill]] %s5541_s18  ;;  %s5482_s26 = smov 64  }
  0x1b   : > { %p3139_p9 = pneg %p3625_p8  ;;  %s5484_s27 = smov 4  }
  0x1c   : > { %s42_s28 = sadd.s32 1, %s3506_s13  ;;  %s59_s29 = sadd.s32 1, %s3498_s11 }
  0x1d   : > { %s312_s21 = sshll.u32 %s5543_s3, 4  ;;  %p3633_p10 = pnand %p3139_p9, %p73_p1  ;;  %s313_s21 = int_to_ptr.hbm [resolvable:$true] %s312_s21 }
  0x1e   : > { %p44_p12 = scmp.ge.s32.totalorder %s42_s28, 2  ;;  %p66_p13 = scmp.ne.s32.totalorder %s3498_s11, %s3494_s10 }
  0x1f   : > { %3142 = dma.hbm_to_vmem [thread:$0]  (!%p3633_p10), %s313_s21, 1024, %s315_s24, [#allocation9], %s5482_s26, %s5482_s26, %s5484_s27  }
  0x20   : > { %p67_p0 = scmp.eq.s32.totalorder %s3510_s14, 0  ;;  %s5800_s28 = smov (%p44_p12, %s42_s28), 0 }
  0x21   : > { %5546 = sst [smem:[#allocation24_spill]] %s5800_s28  ;;  %p3652_p5 = por %p288_p2, %p66_p13 }
  0x22   : > { %p68_p3 = por %p67_p0, %p66_p13  ;;  %s54_s19 = ssub.s32 %s3506_s13, %s5800_s28 }
  0x23   : > { %s5547_s16 = scalar_select %p3652_p5, 1, 0 }
  0x24   : > { %p3166_p7 = scmp.lt.s32.totalorder %s3510_s14, 2  ;;  %p57_p9 = scmp.eq.s32.totalorder %s54_s19, 0 }
  0x25   : > { %5548 = sst [smem:[#allocation25_spill]] %s5547_s16  ;;  %s3660_s20 = sand.u32 1, %s3498_s11  }
  0x26   : > { %s3663_s21 = sshll.u32 %s3506_s13, 7  ;;  %p3665_p11 = pnand %p3166_p7, %p68_p3 }
  0x27   : > { %s3670_s24 = scalar_select %p57_p9, %s3498_s11, %s59_s29  }
  0x28   : > { %s393_s26 = sand.u32 1, %s3510_s14   ;;  %s2813_s27 = sshll.u32 %s3660_s20, 7 }
  0x29   : > { %5550 = sst [smem:[#allocation26_spill]] %s3670_s24  ;;  %s397_s30 = scalar_lea.vmem [#allocation5], %s2813_s27 }
  0x2a   : > { %s5551_s1 = sld [smem:[#allocation77_spill]]  ;;  %s407_s16 = sshll.u32 %s397_s30, 4  ;;  %s408_s16 = int_to_ptr.vmem [resolvable:$true] %s407_s16 }
  0x2b   : > { %s3678_s13 = scalar_lea.sflag [#allocation6], %s393_s26  ;;  %s5552_s9 = smov 4  }
  0x2c   : > { %s5553_s12 = smov 64   ;;  %s5554_s5 = sld [smem:[#allocation79_spill]] }
  0x2d   : > { %s3515_s18 = smov [#allocation10]   ;;  %s5555_s7 = sld [smem:[#allocation80_spill]] }
  0x2e   : > { %s331_s30 = sshll.u32 %s3515_s18, 4  ;;  %s3517_s11 = smov 8   ;;  %s332_s30 = int_to_ptr.vmem [resolvable:$true] %s331_s30 }
  0x2f   : > { %s380_s27 = scalar_lea.hbm %s5472_s0, %s3663_s21 }
  0x30   : > { %s404_s28 = scalar_lea.hbm %s5551_s1, %s3663_s21  ;;  %s3516_s1 = smov 128  }
  0x31   : > { %s405_s19 = sshll.u32 %s404_s28, 4  ;;  %s381_s28 = sshll.u32 %s380_s27, 4  ;;  %s406_s19 = int_to_ptr.hbm [resolvable:$true] %s405_s19  ;;  %s382_s28 = int_to_ptr.hbm [resolvable:$true] %s381_s28 }
  0x32   : > { %3155 = dma.hbm_to_vmem [thread:$0]  (!%p3665_p11), %s406_s19, 2048, %s408_s16, %s3678_s13, %s5553_s12, %s5553_s12, %s5552_s9  }
  0x33   : > { %s329_s3 = sshll.u32 %s5554_s5, 4  ;;  %s346_s26 = sshll.u32 %s5555_s7, 4  ;;  %s330_s3 = int_to_ptr.hbm [resolvable:$true] %s329_s3  ;;  %s347_s26 = int_to_ptr.hbm [resolvable:$true] %s346_s26 }
  0x34   : > { %3145 = dma.hbm_to_vmem [thread:$0]  (!%p3633_p10), %s330_s3, 256, %s332_s30, [#allocation9], %s3516_s1, %s3516_s1, %s3517_s11  }
  0x35   : > { %s3518_s16 = smov [#allocation11]   ;;  %s2810_s19 = sshll.u32 %s3660_s20, 3 }
  0x36   : > { %s348_s24 = sshll.u32 %s3518_s16, 4  ;;  %s369_s5 = scalar_lea.vmem [#allocation2], %s2810_s19  ;;  %s349_s24 = int_to_ptr.vmem [resolvable:$true] %s348_s24 }
  0x37   : > { %3148 = dma.hbm_to_vmem [thread:$0]  (!%p3633_p10), %s347_s26, 1024, %s349_s24, [#allocation12], %s5553_s12, %s5553_s12, %s5552_s9  }
  0x38   : > { %s383_s7 = sshll.u32 %s369_s5, 4  ;;  %s366_s1 = scalar_lea.sflag [#allocation3], %s3660_s20  ;;  %s384_s7 = int_to_ptr.vmem [resolvable:$true] %s383_s7 }
  0x39   : > { %3152 = dma.hbm_to_vmem [thread:$0]  (!%p3665_p11), %s382_s28, 128, %s384_s7, %s366_s1, %s5553_s12, %s5553_s12, %s5552_s9  }
  0x3a   : > { %s2971_s11 = sadd.s32 120, %s3663_s21  ;;  %s421_s25 = scalar_lea.vmem [#allocation7], %s2810_s19 }
  0x3b   : > { %s435_s3 = sshll.u32 %s421_s25, 4  ;;  %s432_s16 = scalar_lea.hbm %s5474_s2, %s2971_s11  ;;  %s436_s3 = int_to_ptr.vmem [resolvable:$true] %s435_s3 }
  0x3c   : > { %s433_s24 = sshll.u32 %s432_s16, 4  ;;  %447 = sbr.rel (%p3625_p8) target bundleno = 650 (0x28a), region = 56  ;;  %s434_s24 = int_to_ptr.hbm [resolvable:$true] %s433_s24 }
  0x3d   : > { %3158 = dma.hbm_to_vmem [thread:$0]  (!%p3665_p11), %s434_s24, 128, %s436_s3, %s3678_s13, %s5553_s12, %s5553_s12, %s5552_s9  }
  0x41   : > { %s3723_s5 = sand.u32 1, %s3494_s10  }
  0x42   : > { %s2820_s7 = sshll.u32 %s3723_s5, 3  ;;  %s450_s20 = scalar_lea.sflag [#allocation3], %s3723_s5 }
  0x43   : > { %s3727_s21 = scalar_lea.vmem [#allocation2], %s2820_s7 }
  0x44   : > { %3469 = dma.done.wait (%p3612_p4), %s450_s20, 128  }
  0x45   : > { %3471 = vsyncadd (%p3612_p4), %s450_s20, 4294967168  ;;  %s459_s9 = sand.u32 1, %s3603_s15   ;;  %s2821_s12 = sshll.u32 %s3723_s5, 7 }
  0x46   : > { %s460_s13 = scalar_lea.sflag [#allocation6], %s459_s9  ;;  %s3737_s22 = scalar_lea.vmem [#allocation5], %s2821_s12 }
  0x47   : > { %3473 = dma.done.wait (%p3612_p4), %s460_s13, 2176  }
  0x48   : > { %3475 = vsyncadd (%p3612_p4), %s460_s13, 4294965120  ;;  %s3743_s23 = scalar_lea.vmem [#allocation7], %s2820_s7 }
  0x49   : > { %3477 = dma.done.wait (%p73_p1), [#allocation9], 1280  }
  0x4a   : > { %3479 = vsyncadd (%p73_p1), [#allocation9], 4294966016 }
  0x4b   : > { %3481 = dma.done.wait (%p73_p1), [#allocation12], 1024  }
  0x4c   : > { %3483 = vsyncadd (%p73_p1), [#allocation12], 4294966272  ;;  %v2997_v0 = vld [vmem:[#allocation8 + $0x38] sm:$0xff]  ;;  %v2996_v1 = vld [vmem:[#allocation8 + $0x30] sm:$0xff]  ;;  %v893_v24 = vlaneseq  ;;  %v3519_v32 = vmov 0.0   ;;  %s5376_s3 = scalar_lea.vmem [#allocation13], %s2821_s12 }
  0x4d   : > { %758 = vmatpush.bf16.msra.mxu0 %v2997_v0  ;;  %3103 = vmatpush.bf16.msra.mxu2 %v2997_v0  ;;  %v2995_v2 = vld [vmem:[#allocation8 + $0x28] sm:$0xff]  ;;  %v2994_v3 = vld [vmem:[#allocation8 + $0x20] sm:$0xff]  ;;  %v2993_v4 = vld [vmem:[#allocation8 + $0x18] sm:$0xff]  ;;  %v3777_v33 = vrot.slane %v3519_v32, 7  ;;  %v3795_v48 = vrot.slane %v3519_v32, 1  ;;  %s5787_s30 = sld [smem:[#allocation21_spill]] }
  0x4e   : > { %v2992_v5 = vld [vmem:[#allocation8 + $0x10] sm:$0xff]  ;;  %v2991_v6 = vld [vmem:[#allocation8 + $0x8] sm:$0xff]  ;;  %v2990_v7 = vld [vmem:[#allocation8] sm:$0xff]  ;;  %v3770_v27 = vshrl.u32 %v893_v24, 7  ;;  %s5788_s7 = sld [smem:[#allocation81_spill]]  ;;  %s2635_s9 = sshll.u32 %s5376_s3, 4  ;;  %s2636_s9 = int_to_ptr.vmem [resolvable:$true] %s2635_s9 }
  0x4f   : > { %v2988_v8 = vld [vmem:[%s3727_s21] sm:$0xff]  ;;  %v2972_v10 = vld [vmem:[%s3737_s22] sm:$0xff]  ;;  %v2973_v12 = vld [vmem:[%s3737_s22 + $0x8] sm:$0xff]  ;;  %5558 = vst [vmem:[#allocation27_spill] sm:$0xff] %v3777_v33  ;;  %s2621_s13 = scalar_lea.sflag [#allocation4], %s3723_s5 }
  0x50   : > { %v2979_v9 = vld [vmem:[%s3737_s22 + $0x38] sm:$0xff]  ;;  %v2980_v11 = vld [vmem:[%s3737_s22 + $0x40] sm:$0xff]  ;;  %v2981_v13 = vld [vmem:[%s3737_s22 + $0x48] sm:$0xff]  ;;  %v1226_v28 = vand.u32 15, %v3770_v27  ;;  %v896_v39 = vadd.s32 16, %v3770_v27  ;;  %v895_v41 = vadd.s32 8, %v3770_v27 }
  0x51   : > { %759 = vmatpush.bf16.msra.mxu0 %v2996_v1  ;;  %3104 = vmatpush.bf16.msra.mxu2 %v2996_v1  ;;  %v2974_v14 = vld [vmem:[%s3737_s22 + $0x10] sm:$0xff]  ;;  %v2975_v16 = vld [vmem:[%s3737_s22 + $0x18] sm:$0xff]  ;;  %v2976_v18 = vld [vmem:[%s3737_s22 + $0x20] sm:$0xff]  ;;  %5559 = vst [vmem:[#allocation28_spill] sm:$0xff] %v3795_v48  ;;  %vm1370_vm1 = vcmp.lt.s32.totalorder %v3770_v27, 1  ;;  %v912_v58 = vadd.s32 144, %v3770_v27 }
  0x52   : > { %v2982_v15 = vld [vmem:[%s3737_s22 + $0x50] sm:$0xff]  ;;  %v2983_v17 = vld [vmem:[%s3737_s22 + $0x58] sm:$0xff]  ;;  %v2984_v19 = vld [vmem:[%s3737_s22 + $0x60] sm:$0xff]  ;;  %vm3773_vm0 = vcmp.ne.s32.totalorder %v1226_v28, 0  ;;  %v1228_v47 = vand.u32 15, %v896_v39  ;;  %v1227_v52 = vand.u32 15, %v895_v41 }
  0x53   : > { %v2977_v20 = vld [vmem:[%s3737_s22 + $0x28] sm:$0xff]  ;;  %v2978_v22 = vld [vmem:[%s3737_s22 + $0x30] sm:$0xff]  ;;  %v2987_v25 = vld [vmem:[%s3737_s22 + $0x78] sm:$0xff]  ;;  %v1479_v38 = vsel %vm3773_vm0, %v3777_v33, 0.0  ;;  %v3814_v62 = vadd.s32 24, %v3770_v27  ;;  %v3817_v63 = vadd.s32 32, %v3770_v27 }
  0x54   : > { %v2985_v21 = vld [vmem:[%s3737_s22 + $0x68] sm:$0xff]  ;;  %v2986_v23 = vld [vmem:[%s3737_s22 + $0x70] sm:$0xff]  ;;  %v3005_v29 = vld [vmem:[#allocation11 + $0x38] sm:$0xff]  ;;  %vm3820_vm2 = vcmp.ne.s32.totalorder %v1228_v47, 0  ;;  %vm1551_vm3 = vcmp.lt.s32.totalorder %v3770_v27, 7  ;;  %vm3827_vm4 = vcmp.ne.s32.totalorder %v1227_v52, 15 }
  0x55   : > { %760 = vmatpush.bf16.msra.mxu0 %v2995_v2  ;;  %3105 = vmatpush.bf16.msra.mxu2 %v2995_v2  ;;  %v3782_v35 = vld [vmem:[%s5476_s4] ss:$0 sm:$0xff]  ;;  %v3003_v45 = vld [vmem:[#allocation11 + $0x28] sm:$0xff]  ;;  %v3002_v61 = vld [vmem:[#allocation11 + $0x20] sm:$0xff]  ;;  %s3006_s26 = sshll.u32 %s5787_s30, 7  ;;  %s3436_s19 = scalar_lea.hbm %s5788_s7, 256 }
  0x56   : > { %2403 = vmatpush.bf16.msra.mxu1 %v3005_v29  ;;  %3111 = vmatpush.bf16.msra.mxu3 %v3005_v29  ;;  %v1696_v36 = vld [vmem:[#allocation10] sm:$0xff]  ;;  %v3872_v29 = vadd.s32 40, %v3770_v27  ;;  %s2634_s20 = scalar_lea.hbm %s5788_s7, %s3006_s26 }
  0x57   : > { %v3004_v37 = vld [vmem:[#allocation11 + $0x30] sm:$0xff]  ;;  %v3788_v40 = vperm.slane %v1696_v36, 0  ;;  %v3791_v42 = vperm.slane %v1696_v36, 1  ;;  %v3798_v50 = vperm.slane %v1696_v36, 2  ;;  %v3800_v51 = vperm.slane %v1696_v36, 4  ;;  %s2637_s12 = sshll.u32 %s2634_s20, 4  ;;  %s2638_s12 = int_to_ptr.hbm [resolvable:$true] %s2637_s12 }
  0x58   : > { %v3803_v53 = vperm.slane %v1696_v36, 7  ;;  %v3825_v2 = vperm.slane %v1696_v36, 3 }
  0x59   : > { %761 = vmatpush.bf16.msra.mxu0 %v2994_v3  ;;  %3106 = vmatpush.bf16.msra.mxu2 %v2994_v3  ;;  %v1699_v43 = vmul.f32 %v3788_v40, %v1479_v38  ;;  %v1732_v49 = vmul.f32 0.0, %v3791_v42  ;;  %5560 = vst [vmem:[#allocation29_spill] sm:$0xff] %v3800_v51  ;;  %v1700_v55 = vmul.f32 %v3788_v40, %v3777_v33  ;;  %v3885_v38 = vadd.s32 48, %v3770_v27 }
  0x5a   : > { %2404 = vmatpush.bf16.msra.mxu1 %v3004_v37  ;;  %3112 = vmatpush.bf16.msra.mxu3 %v3004_v37  ;;  %v1797_v57 = vmul.f32 %v3798_v50, %v3795_v48  ;;  %v3000_v37 = vld [vmem:[#allocation11 + $0x10] sm:$0xff] }
  0x5b   : > { %v1764_v56 = vadd.f32 %v1732_v49, %v1699_v43 }
  0x5d   : > { %762 = vmatpush.bf16.msra.mxu0 %v2993_v4  ;;  %3107 = vmatpush.bf16.msra.mxu2 %v2993_v4  ;;  %v3831_v4 = vperm.slane %v1696_v36, 5 }
  0x5e   : > { %2405 = vmatpush.bf16.msra.mxu1 %v3003_v45  ;;  %3113 = vmatpush.bf16.msra.mxu3 %v3003_v45 }
  0x61   : > { %763 = vmatpush.bf16.msra.mxu0 %v2992_v5  ;;  %3108 = vmatpush.bf16.msra.mxu2 %v2992_v5  ;;  %v3833_v5 = vperm.slane %v1696_v36, 6 }
  0x62   : > { %2406 = vmatpush.bf16.msra.mxu1 %v3002_v61  ;;  %3114 = vmatpush.bf16.msra.mxu3 %v3002_v61  ;;  %v2999_v61 = vld [vmem:[#allocation11 + $0x8] sm:$0xff] }
  0x65   : > { %764 = vmatpush.bf16.msra.mxu0 %v2991_v6  ;;  %3109 = vmatpush.bf16.msra.mxu2 %v2991_v6  ;;  %v3836_v6 = vadd.s32 152, %v3770_v27 }
  0x67   : > { %v1245_v24 = vand.u32 15, %v3836_v6 }
  0x69   : > { %765 = vmatpush.bf16.msra.mxu0 %v2990_v7  ;;  %3110 = vmatpush.bf16.msra.mxu2 %v2990_v7  ;;  %vm4018_vm9 = vcmp.ne.s32.totalorder %v1245_v24, 15 }
  0x6c   : > { %766 = vmatmul.bf16.vlgmr.msra.gmra.mxu0 %v2988_v8  ;;  %806 = vmatmul.bf16.vlgmr.msra.gmra.mxu2 %v2979_v9  ;;  %v3840_v8 = vadd.f32 %v1732_v49, %v1700_v55  ;;  %v3843_v9 = vadd.s32 160, %v3770_v27 }
  0x7c   : > { %771 = vmatmul.bf16.gmra.mxu0 %v2972_v10  ;;  %811 = vmatmul.bf16.gmra.mxu2 %v2980_v11  ;;  %v1244_v10 = vand.u32 15, %v912_v58 }
  0x7e   : > { %vm3875_vm5 = vcmp.ne.s32.totalorder %v1244_v10, 0 }
  0x8c   : > { %776 = vmatmul.bf16.gmra.mxu0 %v2973_v12  ;;  %816 = vmatmul.bf16.gmra.mxu2 %v2981_v13  ;;  %v3001_v12 = vld [vmem:[#allocation11 + $0x18] sm:$0xff]  ;;  %v1229_v13 = vand.u32 15, %v3814_v62 }
  0x8d   : > { %2407 = vmatpush.bf16.msra.mxu1 %v3001_v12  ;;  %3115 = vmatpush.bf16.msra.mxu3 %v3001_v12 }
  0x8e   : > { %vm3921_vm7 = vcmp.ne.s32.totalorder %v1229_v13, 15 }
  0x91   : > { %2408 = vmatpush.bf16.msra.mxu1 %v3000_v37  ;;  %3116 = vmatpush.bf16.msra.mxu3 %v3000_v37 }
  0x95   : > { %2409 = vmatpush.bf16.msra.mxu1 %v2999_v61  ;;  %3117 = vmatpush.bf16.msra.mxu3 %v2999_v61 }
  0x9c   : > { %781 = vmatmul.bf16.gmra.mxu0 %v2974_v14  ;;  %821 = vmatmul.bf16.gmra.mxu2 %v2982_v15  ;;  %v1230_v14 = vand.u32 15, %v3817_v63  ;;  %v3848_v15 = vadd.f32 %v1797_v57, %v1764_v56 }
  0x9e   : > { %vm3917_vm6 = vcmp.ne.s32.totalorder %v1230_v14, 0 }
  0xac   : > { %786 = vmatmul.bf16.gmra.mxu0 %v2975_v16  ;;  %826 = vmatmul.bf16.gmra.mxu2 %v2983_v17 }
  0xbc   : > { %791 = vmatmul.bf16.gmra.mxu0 %v2976_v18  ;;  %831 = vmatmul.bf16.gmra.mxu2 %v2984_v19 }
  0xcc   : > { %796 = vmatmul.bf16.gmra.mxu0 %v2977_v20  ;;  %836 = vmatmul.bf16.gmra.mxu2 %v2985_v21 }
  0xdc   : > { %801 = vmatmul.bf16.gmra.mxu0 %v2978_v22  ;;  %841 = vmatmul.bf16.gmra.mxu2 %v2986_v23 }
  0xe9   : > { %v767_v26 = vpop.f32.mrf.mxu0 }
  0xec   : > { %846 = vmatmul.bf16.gmra.mxu2 %v2987_v25 }
  0xef   : > { %v807_v30 = vpop.f32.mrf.mxu2 }
  0xf0   : > { %v808_v44 = vadd.f32 %v3782_v35, %v807_v30  ;;  %v1246_v30 = vand.u32 15, %v3843_v9 }
  0xf1   : > { %v769_v34 = vpop.f32.mrf.mxu0 }
  0xf2   : > { %v3810_v59 = vmax.f32 %v808_v44, 0.0  ;;  %vm3991_vm8 = vcmp.ne.s32.totalorder %v1246_v30, 0 }
  0xf4   : > { %5561 = vst [vmem:[#allocation30_spill] sm:$0xff] %v3810_v59  ;;  %v3857_v21 = vmul.f32 %v3791_v42, %v3810_v59  ;;  %v3861_v22 = vmul.f32 %v3800_v51, %v3810_v59 }
  0xf6   : > { %5567 = vst [vmem:[#allocation32_spill] sm:$0xff] %v3857_v21 }
  0xf7   : > { %v809_v46 = vpop.f32.mrf.mxu2  ;;  %5568 = vst [vmem:[#allocation33_spill] sm:$0xff] %v3861_v22 }
  0xf8   : > { %v810_v0 = vadd.f32 %v3782_v35, %v809_v46 }
  0xf9   : > { %v772_v54 = vpop.f32.mrf.mxu0 }
  0xfa   : > { %v773_v60 = vadd.f32 %v3782_v35, %v772_v54  ;;  %v3851_v17 = vmax.f32 %v810_v0, 0.0 }
  0xfc   : > { %v3838_v7 = vmax.f32 %v773_v60, 0.0  ;;  %5566 = vst [vmem:[#allocation31_spill] sm:$0xff] %v3851_v17  ;;  %v5494_v39 = vrot.slane %v3851_v17, 7  ;;  %v3891_v43 = vmul.f32 %v3791_v42, %v3851_v17  ;;  %v3896_v45 = vmul.f32 %v3800_v51, %v3851_v17 }
  0xfe   : > { %v1336_v18 = vrot.slane %v3838_v7, 7  ;;  %v1517_v19 = vrot.slane %v3838_v7, 1  ;;  %5572 = vst [vmem:[#allocation35_spill] sm:$0xff] %v3891_v43  ;;  %v1734_v46 = vmul.f32 %v3791_v42, %v3838_v7  ;;  %v1895_v52 = vmul.f32 %v3800_v51, %v3838_v7 }
  0xff   : > { %v812_v20 = vpop.f32.mrf.mxu2  ;;  %5573 = vst [vmem:[#allocation36_spill] sm:$0xff] %v3896_v45 }
 0x100   : > { %v813_v23 = vadd.f32 %v3782_v35, %v812_v20  ;;  %v1404_v25 = vsel %vm1370_vm1, %v3777_v33, %v1336_v18  ;;  %v1585_v26 = vsel %vm1551_vm3, %v3795_v48, %v1517_v19 }
 0x101   : > { %v774_v28 = vpop.f32.mrf.mxu0  ;;  %v1481_v32 = vsel %vm3820_vm2, %v1404_v25, 0.0  ;;  %v1661_v49 = vsel %vm3827_vm4, %v1585_v26, 0.0  ;;  %v3928_v25 = vadd.s32 168, %v3770_v27  ;;  %v3931_v26 = vadd.s32 176, %v3770_v27 }
 0x102   : > { %v3881_v34 = vmax.f32 %v813_v23, 0.0  ;;  %v775_v36 = vadd.f32 %v3782_v35, %v774_v28  ;;  %v1701_v44 = vmul.f32 %v3788_v40, %v1481_v32  ;;  %v1862_v47 = vmul.f32 %v3825_v2, %v1481_v32 }
 0x103   : > { %v1798_v12 = vmul.f32 %v3798_v50, %v1661_v49  ;;  %v5597_v48 = vand.u32 15, %v3931_v26 }
 0x104   : > { %5571 = vst [vmem:[#allocation34_spill] sm:$0xff] %v3881_v34  ;;  %v1352_v54 = vrot.slane %v3881_v34, 7  ;;  %v860_v55 = vmax.f32 %v775_v36, 0.0  ;;  %v5495_v57 = vrot.slane %v3881_v34, 1  ;;  %v3910_v58 = vmul.f32 %v3791_v42, %v3881_v34 }
 0x105   : > { %v3914_v60 = vmul.f32 %v3800_v51, %v3881_v34  ;;  %v1766_v63 = vadd.f32 %v1734_v46, %v1701_v44  ;;  %v1927_v20 = vadd.f32 %v1895_v52, %v1862_v47  ;;  %v3949_v52 = vadd.f32 %v1798_v12, %v3840_v8 }
 0x106   : > { %v1337_v0 = vrot.slane %v860_v55, 7  ;;  %v1518_v1 = vrot.slane %v860_v55, 1  ;;  %v1735_v13 = vmul.f32 %v3791_v42, %v860_v55  ;;  %v1388_v36 = vsel %vm1370_vm1, %v5494_v39, %v1352_v54 }
 0x107   : > { %5574 = vst [vmem:[#allocation37_spill] sm:$0xff] %v3914_v60  ;;  %v814_v3 = vpop.f32.mrf.mxu2  ;;  %v1896_v49 = vmul.f32 %v3800_v51, %v860_v55  ;;  %vm4117_vm12 = vcmp.ne.s32.totalorder %v5597_v48, 0 }
 0x108   : > { %v815_v23 = vadd.f32 %v3782_v35, %v814_v3  ;;  %v1403_v14 = vsel %vm1370_vm1, %v1336_v18, %v1337_v0  ;;  %v1584_v32 = vsel %vm1551_vm3, %v1517_v19, %v1518_v1  ;;  %v2998_v18 = vld [vmem:[#allocation11] sm:$0xff] }
 0x109   : > { %v777_v28 = vpop.f32.mrf.mxu0  ;;  %v1702_v37 = vmul.f32 %v3788_v40, %v1403_v14  ;;  %v1863_v44 = vmul.f32 %v3825_v2, %v1403_v14  ;;  %v1960_v19 = vmul.f32 %v3831_v4, %v1584_v32  ;;  %v1799_v61 = vmul.f32 %v3798_v50, %v1584_v32  ;;  %2410 = vmatpush.bf16.msra.mxu1 %v2998_v18 }
 0x10a   : > { %v3944_v46 = vmax.f32 %v815_v23, 0.0  ;;  %v778_v47 = vadd.f32 %v3782_v35, %v777_v28  ;;  %3118 = vmatpush.bf16.msra.mxu3 %v2998_v18  ;;  %v3958_v14 = vsel %vm3875_vm5, %v1388_v36, 0.0 }
 0x10b   : > { %5580 = vst [vmem:[#allocation39_spill] sm:$0xff] %v3958_v14  ;;  %v1767_v55 = vadd.f32 %v1735_v13, %v1702_v37  ;;  %v1992_v8 = vadd.f32 %v1960_v19, %v1927_v20  ;;  %v1928_v11 = vadd.f32 %v1896_v49, %v1863_v44  ;;  %v3965_v39 = vadd.f32 %v1799_v61, %v1766_v63 }
 0x10c   : > { %5579 = vst [vmem:[#allocation38_spill] sm:$0xff] %v3944_v46  ;;  %v1353_v3 = vrot.slane %v3944_v46, 7  ;;  %v5496_v41 = vrot.slane %v3944_v46, 1  ;;  %v861_v28 = vmax.f32 %v778_v47, 0.0  ;;  %v3963_v32 = vmul.f32 %v3791_v42, %v3944_v46 }
 0x10d   : > { %v1717_v13 = vmul.f32 %v3788_v40, %v3958_v14  ;;  %v3987_v44 = vadd.s32 56, %v3770_v27 }
 0x10e   : > { %v3969_v18 = vsel %vm1370_vm1, %v1352_v54, %v1353_v3  ;;  %v1338_v16 = vrot.slane %v861_v28, 7  ;;  %v1519_v31 = vrot.slane %v861_v28, 1  ;;  %v3977_v20 = vsel %vm1551_vm3, %v5495_v57, %v5496_v41 }
 0x10f   : > { %5581 = vst [vmem:[#allocation40_spill] sm:$0xff] %v3969_v18  ;;  %v817_v36 = vpop.f32.mrf.mxu2  ;;  %v3982_v63 = vmul.f32 %v3791_v42, %v861_v28  ;;  %v1897_v54 = vmul.f32 %v3800_v51, %v861_v28  ;;  %v2058_v57 = vmul.f32 %v3803_v53, %v861_v28  ;;  %v4024_v7 = vmul.f32 %v3788_v40, %v3969_v18 }
 0x110   : > { %5582 = vst [vmem:[#allocation41_spill] sm:$0xff] %v3977_v20  ;;  %v818_v37 = vadd.f32 %v3782_v35, %v817_v36  ;;  %v1402_v19 = vsel %vm1370_vm1, %v1337_v0, %v1338_v16  ;;  %v1583_v61 = vsel %vm1551_vm3, %v1518_v1, %v1519_v31  ;;  %v4001_v36 = vadd.f32 %v1992_v8, %v3848_v15 }
 0x111   : > { %v779_v49 = vpop.f32.mrf.mxu0  ;;  %v4008_v30 = vsel %vm3917_vm6, %v1402_v19, 0.0  ;;  %v1663_v12 = vsel %vm3921_vm7, %v1583_v61, 0.0  ;;  %v5604_v15 = vand.u32 15, %v3928_v25 }
 0x112   : > { %v4003_v23 = vmax.f32 %v818_v37, 0.0  ;;  %v780_v9 = vadd.f32 %v3782_v35, %v779_v49  ;;  %v1961_v0 = vmul.f32 %v3831_v4, %v1663_v12  ;;  %v2025_v1 = vmul.f32 %v3833_v5, %v4008_v30 }
 0x113   : > { %v1800_v28 = vmul.f32 %v3798_v50, %v1663_v12  ;;  %v4030_v49 = vadd.f32 %v3910_v58, %v1717_v13  ;;  %v1864_v62 = vmul.f32 %v3825_v2, %v4008_v30  ;;  %v4045_v37 = vadd.s32 184, %v3770_v27 }
 0x114   : > { %5585 = vst [vmem:[#allocation42_spill] sm:$0xff] %v4003_v23  ;;  %v1354_v10 = vrot.slane %v4003_v23, 7  ;;  %v1535_v8 = vrot.slane %v4003_v23, 1  ;;  %v4034_v6 = vmul.f32 %v3791_v42, %v4003_v23  ;;  %v4038_v24 = vmul.f32 %v3800_v51, %v4003_v23 }
 0x115   : > { %v862_v12 = vmax.f32 %v780_v9, 0.0  ;;  %v1993_v19 = vadd.f32 %v1961_v0, %v1928_v11  ;;  %v2090_v61 = vadd.f32 %v2058_v57, %v2025_v1  ;;  %v4040_v41 = vadd.f32 %v1800_v28, %v1767_v55  ;;  %v4061_v1 = vld [vmem:[#allocation10 + $0x8] ss:$0 sm:$0xff] }
 0x116   : > { %v5588_v23 = vand.u32 15, %v3872_v29  ;;  %v1386_v11 = vsel %vm1370_vm1, %v1353_v3, %v1354_v10  ;;  %v5591_v29 = vand.u32 15, %v3885_v38  ;;  %vm4147_vm13 = vcmp.ne.s32.totalorder %v5604_v15, 15 }
 0x117   : > { %v1339_v58 = vrot.slane %v862_v12, 7  ;;  %v1520_v13 = vrot.slane %v862_v12, 1  ;;  %v4048_v56 = vmul.f32 %v3791_v42, %v862_v12  ;;  %v819_v43 = vpop.f32.mrf.mxu2  ;;  %v1898_v57 = vmul.f32 %v3800_v51, %v862_v12 }
 0x118   : > { %vm4052_vm10 = vcmp.ne.s32.totalorder %v5588_v23, 15  ;;  %v820_v55 = vadd.f32 %v3782_v35, %v819_v43  ;;  %v2059_v0 = vmul.f32 %v3803_v53, %v862_v12  ;;  %v4064_v28 = vadd.f32 %v1993_v19, %v3949_v52 }
 0x119   : > { %vm4068_vm11 = vcmp.ne.s32.totalorder %v5591_v29, 0  ;;  %v782_v60 = vpop.f32.mrf.mxu0  ;;  %v4074_v3 = vsel %vm1370_vm1, %v1338_v16, %v1339_v58  ;;  %v4078_v43 = vsel %vm1551_vm3, %v1519_v31, %v1520_v13  ;;  %v1929_v12 = vadd.f32 %v1897_v54, %v1864_v62 }
 0x11a   : > { %v4081_v52 = vmax.f32 %v820_v55, 0.0  ;;  %v783_v38 = vadd.f32 %v3782_v35, %v782_v60  ;;  %v2026_v19 = vmul.f32 %v3833_v5, %v4074_v3  ;;  %v2123_v29 = vmul.f32 %v4061_v1, %v4078_v43 }
 0x11b   : > { %v1865_v16 = vmul.f32 %v3825_v2, %v4074_v3  ;;  %v1962_v31 = vmul.f32 %v3831_v4, %v4078_v43  ;;  %v4094_v62 = vsel %vm3991_vm8, %v1386_v11, 0.0  ;;  %v5596_v54 = vrot.slane %v3944_v46, 1 }
 0x11c   : > { %5594 = vst [vmem:[#allocation43_spill] sm:$0xff] %v4081_v52  ;;  %v1355_v55 = vrot.slane %v4081_v52, 7  ;;  %v1536_v21 = vrot.slane %v4081_v52, 1  ;;  %v4104_v18 = vmul.f32 %v3791_v42, %v4081_v52  ;;  %v4108_v14 = vmul.f32 %v3800_v51, %v4081_v52 }
 0x11d   : > { %5595 = vst [vmem:[#allocation44_spill] sm:$0xff] %v4094_v62  ;;  %v1567_v60 = vsel %vm1551_vm3, %v5596_v54, %v1535_v8  ;;  %v863_v47 = vmax.f32 %v783_v38, 0.0  ;;  %v2091_v11 = vadd.f32 %v2059_v0, %v2026_v19  ;;  %v2155_v45 = vadd.f32 %v2123_v29, %v2090_v61  ;;  %v4113_v54 = vld [vmem:[%s5478_s6] ss:$0 sm:$0xff] }
 0x11e   : > { %v1930_v22 = vadd.f32 %v1898_v57, %v1865_v16  ;;  %v1994_v46 = vadd.f32 %v1962_v31, %v1929_v12  ;;  %v4123_v52 = vsel %vm1370_vm1, %v1354_v10, %v1355_v55  ;;  %v4127_v61 = vsel %vm1551_vm3, %v1535_v8, %v1536_v21 }
 0x11f   : > { %5600 = vst [vmem:[#allocation45_spill] sm:$0xff] %v4123_v52  ;;  %v4131_v57 = vsel %vm4018_vm9, %v1567_v60, 0.0  ;;  %v1340_v0 = vrot.slane %v863_v47, 7  ;;  %v1521_v12 = vrot.slane %v863_v47, 1  ;;  %v4134_v26 = vmul.f32 %v3791_v42, %v863_v47  ;;  %v822_v38 = vpop.f32.mrf.mxu2 }
 0x120   : > { %5601 = vst [vmem:[#allocation46_spill] sm:$0xff] %v4127_v61  ;;  %v4137_v48 = vmul.f32 %v3800_v51, %v863_v47  ;;  %v823_v10 = vadd.f32 %v3782_v35, %v822_v38  ;;  %v2219_v19 = vadd.f32 %v4001_v36, %v2155_v45  ;;  %v2060_v8 = vmul.f32 %v3803_v53, %v863_v47 }
 0x121   : > { %5602 = vst [vmem:[#allocation47_spill] sm:$0xff] %v4131_v57  ;;  %v4143_v29 = vadd.f32 %v1994_v46, %v3965_v39  ;;  %v784_v31 = vpop.f32.mrf.mxu0  ;;  %v1581_v60 = vsel %vm1551_vm3, %v1520_v13, %v1521_v12  ;;  %v1400_v38 = vsel %vm1370_vm1, %v1339_v58, %v1340_v0  ;;  %v1783_v45 = vadd.f32 %v3963_v32, %v4024_v7 }
 0x122   : > { %5603 = vst [vmem:[#allocation48_spill] sm:$0xff] %v4134_v26  ;;  %v1815_v39 = vmul.f32 %v3798_v50, %v3977_v20  ;;  %v4159_v46 = vmax.f32 %v823_v10, 0.0  ;;  %v785_v25 = vadd.f32 %v3782_v35, %v784_v31  ;;  %v4164_v36 = vsel %vm4052_vm10, %v1581_v60, 0.0 }
 0x123   : > { %v2255_v47 = vadd.f32 %v4113_v54, %v2219_v19  ;;  %v2124_v13 = vmul.f32 %v4061_v1, %v4164_v36  ;;  %v4171_v58 = vsel %vm4068_vm11, %v1400_v38, 0.0  ;;  %v1963_v32 = vmul.f32 %v3831_v4, %v4164_v36 }
 0x124   : > { %v1816_v7 = vmul.f32 %v3798_v50, %v4131_v57  ;;  %v1356_v10 = vrot.slane %v4159_v46, 7  ;;  %v1537_v9 = vrot.slane %v4159_v46, 1  ;;  %v4181_v19 = vmul.f32 %v3791_v42, %v4159_v46 }
 0x125   : > { %v4185_v15 = vmul.f32 %v3800_v51, %v4159_v46  ;;  %v4187_v23 = vmax.f32 %v785_v25, 0.0  ;;  %v2156_v31 = vadd.f32 %v2124_v13, %v2091_v11  ;;  %v2287_v60 = vmax.f32 %v2255_v47, 0.0 }
 0x126   : > { %5607 = vst [vmem:[#allocation49_spill] sm:$0xff] %v4181_v19  ;;  %v1995_v38 = vadd.f32 %v1963_v32, %v1930_v22  ;;  %v2027_v57 = vmul.f32 %v3833_v5, %v4171_v58  ;;  %v1384_v20 = vsel %vm1370_vm1, %v1355_v55, %v1356_v10  ;;  %v1565_v17 = vsel %vm1551_vm3, %v1536_v21, %v1537_v9 }
 0x127   : > { %5608 = vst [vmem:[#allocation50_spill] sm:$0xff] %v4185_v15  ;;  %v4196_v59 = vadd.f32 %v1815_v39, %v4030_v49  ;;  %v1522_v25 = vrot.slane %v4187_v23, 1  ;;  %v4202_v11 = vmul.f32 %v3791_v42, %v4187_v23  ;;  %v4206_v22 = vmul.f32 %v3800_v51, %v4187_v23  ;;  %v824_v47 = vpop.f32.mrf.mxu2 }
 0x128   : > { %v5610_v55 = vand.u32 15, %v3987_v44  ;;  %v825_v49 = vadd.f32 %v3782_v35, %v824_v47  ;;  %v2220_v39 = vadd.f32 %v4064_v28, %v2156_v31  ;;  %v2061_v13 = vmul.f32 %v3803_v53, %v4187_v23 }
 0x129   : > { %5609 = vst [vmem:[#allocation51_spill] sm:$0xff] %v4202_v11  ;;  %v2092_v32 = vadd.f32 %v2060_v8, %v2027_v57  ;;  %v787_v33 = vpop.f32.mrf.mxu0  ;;  %v5613_v19 = vrot.slane %v4187_v23, 7  ;;  %v4226_v44 = vsel %vm1551_vm3, %v1521_v12, %v1522_v25  ;;  %v4233_v28 = vsel %vm4117_vm12, %v1384_v20, 0.0 }
 0x12a   : > { %vm4210_vm14 = vcmp.ne.s32.totalorder %v5610_v55, 15  ;;  %v4229_v55 = vadd.f32 %v1995_v38, %v4040_v41  ;;  %v4235_v31 = vmax.f32 %v825_v49, 0.0  ;;  %v788_v57 = vadd.f32 %v3782_v35, %v787_v33 }
 0x12b   : > { %v4222_v11 = vsel %vm1370_vm1, %v1340_v0, %v5613_v19  ;;  %v2256_v8 = vadd.f32 %v4113_v54, %v2220_v39  ;;  %v2125_v12 = vmul.f32 %v4061_v1, %v4226_v44  ;;  %v4245_v41 = vsel %vm4147_vm13, %v1565_v17, 0.0 }
 0x12c   : > { %v2028_v0 = vmul.f32 %v3833_v5, %v4222_v11  ;;  %5614 = vst [vmem:[#allocation52_spill] sm:$0xff] %v4245_v41  ;;  %v1848_v19 = vadd.f32 %v1816_v7, %v1783_v45  ;;  %v1880_v34 = vmul.f32 %v3825_v2, %v4094_v62  ;;  %v5519_v20 = vrot.slane %v4235_v31, 7 }
 0x12d   : > { %v1538_v33 = vrot.slane %v4235_v31, 1  ;;  %v4253_v38 = vmul.f32 %v3791_v42, %v4235_v31  ;;  %v4257_v47 = vmul.f32 %v3800_v51, %v4235_v31  ;;  %v4259_v49 = vmax.f32 %v788_v57, 0.0 }
 0x12e   : > { %v2288_v17 = vmax.f32 %v2256_v8, 0.0  ;;  %v2093_v16 = vadd.f32 %v2061_v13, %v2028_v0  ;;  %v2157_v45 = vadd.f32 %v2125_v12, %v2092_v32  ;;  %v5617_v7 = vand.u32 15, %v4045_v37 }
 0x12f   : > { %5615 = vst [vmem:[#allocation53_spill] sm:$0xff] %v4253_v38  ;;  %v4271_v38 = vsel %vm1370_vm1, %v1356_v10, %v5519_v20  ;;  %v4275_v26 = vsel %vm1551_vm3, %v1537_v9, %v1538_v33  ;;  %v1881_v13 = vmul.f32 %v3825_v2, %v4123_v52  ;;  %v1945_v32 = vadd.f32 %v4038_v24, %v1880_v34  ;;  %v827_v0 = vpop.f32.mrf.mxu2 }
 0x130   : > { %5616 = vst [vmem:[#allocation54_spill] sm:$0xff] %v4257_v47  ;;  %vm4263_vm15 = vcmp.ne.s32.totalorder %v5617_v7, 15  ;;  %v5520_v57 = vrot.slane %v4259_v49, 1  ;;  %v4284_v8 = vmul.f32 %v3791_v42, %v4259_v49  ;;  %v4288_v10 = vmul.f32 %v3800_v51, %v4259_v49 }
 0x131   : > { %v2319_v9 = vpack.c.bf16 %v2288_v17, %v2287_v60  ;;  %v828_v12 = vadd.f32 %v3782_v35, %v827_v0  ;;  %v2221_v7 = vadd.f32 %v4143_v29, %v2157_v45  ;;  %v1946_v24 = vadd.f32 %v4108_v14, %v1881_v13  ;;  %v789_v34 = vpop.f32.mrf.mxu0 }
 0x132   : > { %5620 = vst [vmem:[#allocation55_spill] sm:$0xff] %v4284_v8  ;;  %v1579_v20 = vsel %vm1551_vm3, %v1522_v25, %v5520_v57  ;;  %v1978_v37 = vmul.f32 %v3831_v4, %v4127_v61  ;;  %v1979_v8 = vmul.f32 %v3831_v4, %v4245_v41  ;;  %v2043_v60 = vmul.f32 %v3833_v5, %v4233_v28 }
 0x133   : > { %5621 = vst [vmem:[#allocation56_spill] sm:$0xff] %v4288_v10  ;;  %2411 = vmatmul.bf16.vlgmr.msra.gmra.mxu1 %v2319_v9  ;;  %v4303_v17 = vmax.f32 %v828_v12, 0.0  ;;  %v790_v14 = vadd.f32 %v3782_v35, %v789_v34  ;;  %v4308_v29 = vsel %vm4210_vm14, %v1579_v20, 0.0  ;;  %v2257_v25 = vadd.f32 %v4113_v54, %v2221_v7 }
 0x134   : > { %v2126_v45 = vmul.f32 %v4061_v1, %v4308_v29  ;;  %v2010_v13 = vadd.f32 %v1978_v37, %v1945_v32  ;;  %v2011_v0 = vadd.f32 %v1979_v8, %v1946_v24  ;;  %v2044_v57 = vmul.f32 %v3833_v5, %v4271_v38 }
 0x135   : > { %v5521_v12 = vrot.slane %v4303_v17, 1  ;;  %v4319_v34 = vmul.f32 %v3791_v42, %v4303_v17  ;;  %v4323_v21 = vmul.f32 %v3800_v51, %v4303_v17  ;;  %v4325_v20 = vmax.f32 %v790_v14, 0.0 }
 0x136   : > { %v2158_v7 = vadd.f32 %v2126_v45, %v2093_v16  ;;  %v2289_v32 = vmax.f32 %v2257_v25, 0.0  ;;  %v2076_v37 = vmul.f32 %v3803_v53, %v4159_v46  ;;  %v2077_v24 = vmul.f32 %v3803_v53, %v4235_v31 }
 0x137   : > { %5622 = vst [vmem:[#allocation57_spill] sm:$0xff] %v4319_v34  ;;  %v1563_v8 = vsel %vm1551_vm3, %v1538_v33, %v5521_v12  ;;  %v2141_v9 = vmul.f32 %v4061_v1, %v4275_v26  ;;  %v2205_v34 = vadd.f32 %v2010_v13, %v4196_v59  ;;  %v1524_v16 = vrot.slane %v4325_v20, 1  ;;  %v829_v33 = vpop.f32.mrf.mxu2 }
 0x138   : > { %5623 = vst [vmem:[#allocation58_spill] sm:$0xff] %v4323_v21  ;;  %v4342_v46 = vmul.f32 %v3791_v42, %v4325_v20  ;;  %v4346_v25 = vmul.f32 %v3800_v51, %v4325_v20  ;;  %v830_v45 = vadd.f32 %v3782_v35, %v829_v33  ;;  %v2222_v12 = vadd.f32 %v4229_v55, %v2158_v7 }
 0x139   : > { %v4352_v59 = vsel %vm4263_vm15, %v1563_v8, 0.0  ;;  %v2108_v13 = vadd.f32 %v2076_v37, %v2043_v60  ;;  %v792_v14 = vpop.f32.mrf.mxu0  ;;  %v2109_v21 = vadd.f32 %v2077_v24, %v2044_v57  ;;  %v902_v47 = vadd.s32 64, %v3770_v27 }
 0x13a   : > { %5624 = vst [vmem:[#allocation59_spill] sm:$0xff] %v4342_v46  ;;  %v2142_v10 = vmul.f32 %v4061_v1, %v4352_v59  ;;  %v2206_v46 = vadd.f32 %v2011_v0, %v1848_v19  ;;  %v4357_v15 = vmax.f32 %v830_v45, 0.0  ;;  %v2258_v33 = vadd.f32 %v4113_v54, %v2222_v12 }
 0x13b   : > { %5625 = vst [vmem:[#allocation60_spill] sm:$0xff] %v4346_v25  ;;  %v793_v25 = vadd.f32 %v3782_v35, %v792_v14  ;;  %v2173_v55 = vadd.f32 %v2141_v9, %v2108_v13  ;;  %v903_v39 = vadd.s32 72, %v3770_v27  ;;  %v1234_v8 = vand.u32 15, %v902_v47 }
 0x13c   : > { %v2174_v7 = vadd.f32 %v2142_v10, %v2109_v21  ;;  %v5626_v60 = vrot.slane %v4325_v20, 7  ;;  %v5627_v57 = vrot.slane %v4259_v49, 7  ;;  %v4374_v12 = vmul.f32 %v3791_v42, %v4357_v15 }
 0x13d   : > { %v4378_v10 = vmul.f32 %v3800_v51, %v4357_v15  ;;  %v4380_v47 = vmax.f32 %v793_v25, 0.0  ;;  %v2290_v9 = vmax.f32 %v2258_v33, 0.0  ;;  %v2237_v21 = vadd.f32 %v2205_v34, %v2173_v55 }
 0x13e   : > { %v4368_v19 = vsel %vm1370_vm1, %v5627_v57, %v5626_v60  ;;  %5628 = vst [vmem:[#allocation61_spill] sm:$0xff] %v4374_v12  ;;  %v2238_v24 = vadd.f32 %v2206_v46, %v2174_v7  ;;  %v1235_v14 = vand.u32 15, %v903_v39  ;;  %vm1270_vm0 = vcmp.ne.s32.totalorder %v1234_v8, 0 }
 0x13f   : > { %v5629_v45 = vmov %v5627_v57  ;;  %v5630_v13 = vrot.slane %v4187_v23, 7  ;;  %v5631_v57 = vrot.slane %v4259_v49, 1  ;;  %v5522_v34 = vrot.slane %v4380_v47, 1  ;;  %v832_v33 = vpop.f32.mrf.mxu2 }
 0x140   : > { %v4398_v46 = vmul.f32 %v3791_v42, %v4380_v47  ;;  %v4402_v23 = vmul.f32 %v3800_v51, %v4380_v47  ;;  %v2320_v55 = vpack.c.bf16 %v2290_v9, %v2289_v32  ;;  %v833_v7 = vadd.f32 %v3782_v35, %v832_v33 }
 0x141   : > { %v1398_v60 = vsel %vm1370_vm1, %v5630_v13, %v5629_v45  ;;  %v4392_v37 = vsel %vm1551_vm3, %v5631_v57, %v1524_v16  ;;  %v2273_v39 = vadd.f32 %v4113_v54, %v2237_v21  ;;  %v2274_v8 = vadd.f32 %v4113_v54, %v2238_v24  ;;  %v794_v45 = vpop.f32.mrf.mxu0 }
 0x142   : > { %5632 = vst [vmem:[#allocation62_spill] sm:$0xff] %v4398_v46  ;;  %vm1307_vm2 = vcmp.ne.s32.totalorder %v1235_v14, 15  ;;  %v4407_v13 = vsel %vm1270_vm0, %v1398_v60, 0.0  ;;  %v1577_v57 = vsel %vm1551_vm3, %v1524_v16, %v5522_v34  ;;  %v1703_v25 = vmul.f32 %v3788_v40, %v4008_v30 }
 0x143   : > { %5633 = vst [vmem:[#allocation63_spill] sm:$0xff] %v4402_v23  ;;  %2416 = vmatmul.bf16.gmra.mxu1 %v2320_v55  ;;  %v4415_v32 = vmax.f32 %v833_v7, 0.0  ;;  %v795_v9 = vadd.f32 %v3782_v35, %v794_v45  ;;  %v2305_v21 = vmax.f32 %v2273_v39, 0.0  ;;  %v2306_v33 = vmax.f32 %v2274_v8, 0.0 }
 0x144   : > { %v4418_v24 = vsel %vm1307_vm2, %v1577_v57, 0.0  ;;  %v1704_v14 = vmul.f32 %v3788_v40, %v4074_v3  ;;  %v1768_v60 = vadd.f32 %v3982_v63, %v1703_v25  ;;  %v1801_v16 = vmul.f32 %v3798_v50, %v4078_v43 }
 0x145   : > { %v4429_v55 = vmul.f32 %v3791_v42, %v4415_v32  ;;  %v4433_v7 = vmul.f32 %v3800_v51, %v4415_v32  ;;  %v4435_v39 = vmax.f32 %v795_v9, 0.0  ;;  %v2328_v3 = vpack.c.bf16 %v2306_v33, %v2305_v21 }
 0x146   : > { %v1769_v63 = vadd.f32 %v4048_v56, %v1704_v14  ;;  %v1802_v43 = vmul.f32 %v3798_v50, %v4164_v36  ;;  %v1833_v25 = vadd.f32 %v1801_v16, %v1768_v60  ;;  %v1866_v8 = vmul.f32 %v3825_v2, %v4171_v58 }
 0x147   : > { %5634 = vst [vmem:[#allocation64_spill] sm:$0xff] %v4429_v55  ;;  %v1867_v45 = vmul.f32 %v3825_v2, %v4222_v11  ;;  %v1964_v57 = vmul.f32 %v3831_v4, %v4226_v44  ;;  %v4450_v56 = vmul.f32 %v3791_v42, %v4435_v39  ;;  %v4454_v36 = vmul.f32 %v3800_v51, %v4435_v39  ;;  %v834_v21 = vpop.f32.mrf.mxu2 }
 0x148   : > { %5635 = vst [vmem:[#allocation65_spill] sm:$0xff] %v4433_v7  ;;  %2456 = vmatmul.bf16.vlgmr.msra.gmra.mxu3 %v2328_v3  ;;  %v835_v33 = vadd.f32 %v3782_v35, %v834_v21  ;;  %v1834_v14 = vadd.f32 %v1802_v43, %v1769_v63  ;;  %v1931_v60 = vadd.f32 %v4137_v48, %v1866_v8  ;;  %v5641_v46 = vrot.slane %v4303_v17, 7 }
 0x149   : > { %5636 = vst [vmem:[#allocation66_spill] sm:$0xff] %v4450_v56  ;;  %v1932_v16 = vadd.f32 %v4206_v22, %v1867_v45  ;;  %v797_v34 = vpop.f32.mrf.mxu0  ;;  %v1965_v9 = vmul.f32 %v3831_v4, %v4308_v29  ;;  %v2029_v30 = vmul.f32 %v3833_v5, %v4407_v13  ;;  %v2030_v0 = vmul.f32 %v3833_v5, %v4368_v19 }
 0x14a   : > { %5637 = vst [vmem:[#allocation67_spill] sm:$0xff] %v4454_v36  ;;  %v2062_v3 = vmul.f32 %v3803_v53, %v4259_v49  ;;  %v4467_v55 = vmax.f32 %v835_v33, 0.0  ;;  %v798_v63 = vadd.f32 %v3782_v35, %v797_v34  ;;  %v1996_v48 = vadd.f32 %v1964_v57, %v1931_v60 }
 0x14b   : > { %v2063_v22 = vmul.f32 %v3803_v53, %v4325_v20  ;;  %v1997_v43 = vadd.f32 %v1965_v9, %v1932_v16  ;;  %v2127_v45 = vmul.f32 %v4061_v1, %v4392_v37  ;;  %v2128_v21 = vmul.f32 %v4061_v1, %v4418_v24 }
 0x14c   : > { %v2094_v8 = vadd.f32 %v2062_v3, %v2029_v30  ;;  %v4480_v33 = vmul.f32 %v3791_v42, %v4467_v55  ;;  %v4484_v34 = vmul.f32 %v3800_v51, %v4467_v55  ;;  %v4486_v57 = vmax.f32 %v798_v63, 0.0 }
 0x14d   : > { %v2095_v30 = vadd.f32 %v2063_v22, %v2030_v0  ;;  %v2191_v60 = vadd.f32 %v1996_v48, %v1833_v25  ;;  %v2192_v16 = vadd.f32 %v1997_v43, %v1834_v14  ;;  %v918_v3 = vadd.s32 192, %v3770_v27 }
 0x14e   : > { %5638 = vst [vmem:[#allocation68_spill] sm:$0xff] %v4480_v33  ;;  %v2159_v9 = vadd.f32 %v2127_v45, %v2094_v8  ;;  %v919_v56 = vadd.s32 200, %v3770_v27  ;;  %v5640_v49 = vrot.slane %v4357_v15, 7  ;;  %v4502_v0 = vmul.f32 %v3791_v42, %v4486_v57 }
 0x14f   : > { %5639 = vst [vmem:[#allocation69_spill] sm:$0xff] %v4484_v34  ;;  %v4506_v25 = vmul.f32 %v3800_v51, %v4486_v57  ;;  %v837_v14 = vpop.f32.mrf.mxu2  ;;  %v2160_v48 = vadd.f32 %v2128_v21, %v2095_v30  ;;  %v1250_v8 = vand.u32 15, %v918_v3  ;;  %v5645_v34 = vrot.slane %v4235_v31, 7 }
 0x150   : > { %v4496_v33 = vsel %vm1370_vm1, %v5641_v46, %v5640_v49  ;;  %5642 = vst [vmem:[#allocation70_spill] sm:$0xff] %v4502_v0  ;;  %v2223_v22 = vadd.f32 %v2191_v60, %v2159_v9  ;;  %v838_v43 = vadd.f32 %v3782_v35, %v837_v14  ;;  %v1251_v45 = vand.u32 15, %v919_v56 }
 0x151   : > { %5643 = vst [vmem:[#allocation71_spill] sm:$0xff] %v4506_v25  ;;  %v799_v46 = vpop.f32.mrf.mxu0  ;;  %v5644_v49 = vrot.slane %v4303_v17, 7  ;;  %v5646_v0 = vrot.slane %v4415_v32, 1  ;;  %v5647_v7 = vrot.slane %v4357_v15, 1  ;;  %v5649_v9 = vrot.slane %v4303_v17, 1 }
 0x152   : > { %v2224_v60 = vadd.f32 %v2192_v16, %v2160_v48  ;;  %v2259_v31 = vadd.f32 %v4113_v54, %v2223_v22  ;;  %v4530_v3 = vmax.f32 %v838_v43, 0.0  ;;  %vm1286_vm4 = vcmp.ne.s32.totalorder %v1250_v8, 0 }
 0x153   : > { %v1382_v63 = vsel %vm1370_vm1, %v5645_v34, %v5644_v49  ;;  %v1561_v21 = vsel %vm1551_vm3, %v5647_v7, %v5646_v0  ;;  %v5648_v30 = vmov %v5647_v7  ;;  %v800_v34 = vadd.f32 %v3782_v35, %v799_v46 }
 0x154   : > { %v4527_v56 = vsel %vm1551_vm3, %v5649_v9, %v5648_v30  ;;  %vm1323_vm5 = vcmp.ne.s32.totalorder %v1251_v45, 15  ;;  %v1719_v7 = vmul.f32 %v3788_v40, %v4094_v62  ;;  %v1720_v0 = vmul.f32 %v3788_v40, %v4123_v52 }
 0x155   : > { %v2260_v14 = vadd.f32 %v4113_v54, %v2224_v60  ;;  %v2291_v49 = vmax.f32 %v2259_v31, 0.0  ;;  %v4542_v48 = vmul.f32 %v3791_v42, %v4530_v3  ;;  %v4546_v22 = vmul.f32 %v3800_v51, %v4530_v3 }
 0x156   : > { %v4548_v43 = vmax.f32 %v800_v34, 0.0  ;;  %v4550_v8 = vsel %vm1286_vm4, %v1382_v63, 0.0  ;;  %v4552_v45 = vsel %vm1323_vm5, %v1561_v21, 0.0  ;;  %v1784_v9 = vadd.f32 %v4034_v6, %v1719_v7 }
 0x157   : > { %5650 = vst [vmem:[#allocation72_spill] sm:$0xff] %v4542_v48  ;;  %v2292_v46 = vmax.f32 %v2260_v14, 0.0  ;;  %v1785_v60 = vadd.f32 %v4104_v18, %v1720_v0  ;;  %v1817_v21 = vmul.f32 %v3798_v50, %v4127_v61  ;;  %v1818_v6 = vmul.f32 %v3798_v50, %v4245_v41  ;;  %v5655_v61 = vld [vmem:[#allocation50_spill] sm:$0xff] }
 0x158   : > { %5651 = vst [vmem:[#allocation73_spill] sm:$0xff] %v4546_v22  ;;  %v4560_v16 = vmul.f32 %v3791_v42, %v4548_v43  ;;  %v4564_v34 = vmul.f32 %v3800_v51, %v4548_v43  ;;  %v1882_v18 = vmul.f32 %v3825_v2, %v4233_v28  ;;  %v1883_v7 = vmul.f32 %v3825_v2, %v4271_v38  ;;  %v5656_v48 = vld [vmem:[#allocation54_spill] sm:$0xff] }
 0x159   : > { %5652 = vst [vmem:[#allocation74_spill] sm:$0xff] %v4548_v43  ;;  %v2321_v63 = vpack.c.bf16 %v2292_v46, %v2291_v49  ;;  %v1980_v0 = vmul.f32 %v3831_v4, %v4275_v26  ;;  %v1981_v14 = vmul.f32 %v3831_v4, %v4352_v59  ;;  %v2045_v49 = vmul.f32 %v3833_v5, %v4550_v8  ;;  %v839_v46 = vpop.f32.mrf.mxu2  ;;  %v802_v30 = vpop.f32.mrf.mxu0 }
 0x15a   : > { %5653 = vst [vmem:[#allocation75_spill] sm:$0xff] %v4560_v16  ;;  %v1849_v31 = vadd.f32 %v1817_v21, %v1784_v9  ;;  %v1850_v41 = vadd.f32 %v1818_v6, %v1785_v60  ;;  %v1947_v52 = vadd.f32 %v5655_v61, %v1882_v18  ;;  %v2046_v62 = vmul.f32 %v3833_v5, %v4496_v33 }
 0x15b   : > { %5654 = vst [vmem:[#allocation76_spill] sm:$0xff] %v4564_v34  ;;  %2421 = vmatmul.bf16.gmra.mxu1 %v2321_v63  ;;  %v1948_v16 = vadd.f32 %v5656_v48, %v1883_v7  ;;  %v2078_v22 = vmul.f32 %v3803_v53, %v4303_v17  ;;  %v2079_v34 = vmul.f32 %v3803_v53, %v4357_v15  ;;  %v904_v6 = vadd.s32 80, %v3770_v27 }
 0x15c   : > { %v2143_v25 = vmul.f32 %v4061_v1, %v4527_v56  ;;  %v2012_v12 = vadd.f32 %v1980_v0, %v1947_v52  ;;  %v2144_v9 = vmul.f32 %v4061_v1, %v4552_v45  ;;  %v840_v61 = vadd.f32 %v3782_v35, %v839_v46 }
 0x15d   : > { %v803_v60 = vadd.f32 %v3782_v35, %v802_v30  ;;  %v2013_v63 = vadd.f32 %v1981_v14, %v1948_v16  ;;  %v2110_v21 = vadd.f32 %v2078_v22, %v2045_v49  ;;  %v2111_v48 = vadd.f32 %v2079_v34, %v2046_v62 }
 0x15e   : > { %v2207_v17 = vadd.f32 %v2012_v12, %v1849_v31  ;;  %v4595_v18 = vmax.f32 %v840_v61, 0.0  ;;  %v905_v36 = vadd.s32 88, %v3770_v27  ;;  %v1236_v43 = vand.u32 15, %v904_v6 }
 0x15f   : > { %v4597_v7 = vmax.f32 %v803_v60, 0.0  ;;  %v2175_v52 = vadd.f32 %v2143_v25, %v2110_v21  ;;  %v2176_v0 = vadd.f32 %v2144_v9, %v2111_v48  ;;  %v2208_v23 = vadd.f32 %v2013_v63, %v1850_v41 }
 0x160   : > { %v4604_v62 = vmul.f32 %v3791_v42, %v4595_v18  ;;  %v4608_v12 = vmul.f32 %v3800_v51, %v4595_v18  ;;  %v1237_v34 = vand.u32 15, %v905_v36  ;;  %vm1272_vm6 = vcmp.ne.s32.totalorder %v1236_v43, 0 }
 0x161   : > { %v2239_v30 = vadd.f32 %v2207_v17, %v2175_v52  ;;  %v2240_v16 = vadd.f32 %v2208_v23, %v2176_v0  ;;  %v4614_v41 = vmul.f32 %v3791_v42, %v4597_v7  ;;  %v4618_v31 = vmul.f32 %v3800_v51, %v4597_v7 }
 0x162   : > { %v5658_v23 = vrot.slane %v4435_v39, 7  ;;  %v5659_v9 = vrot.slane %v4380_v47, 7  ;;  %v5661_v63 = vrot.slane %v4325_v20, 7  ;;  %vm1309_vm7 = vcmp.ne.s32.totalorder %v1237_v34, 15 }
 0x163   : > { %5657 = vst [vmem:[#allocation50_spill] sm:$0xff] %v4614_v41  ;;  %v2275_v14 = vadd.f32 %v4113_v54, %v2239_v30  ;;  %v2276_v49 = vadd.f32 %v4113_v54, %v2240_v16  ;;  %v5662_v21 = vrot.slane %v4486_v57, 1  ;;  %v5663_v48 = vrot.slane %v4435_v39, 1 }
 0x164   : > { %v4628_v61 = vsel %vm1370_vm1, %v5659_v9, %v5658_v23  ;;  %v5660_v60 = vmov %v5659_v9  ;;  %v5665_v52 = vrot.slane %v4380_v47, 1  ;;  %v1705_v34 = vmul.f32 %v3788_v40, %v4171_v58 }
 0x165   : > { %v1396_v36 = vsel %vm1370_vm1, %v5661_v63, %v5660_v60  ;;  %v1575_v6 = vsel %vm1551_vm3, %v5663_v48, %v5662_v21  ;;  %v5664_v17 = vmov %v5663_v48  ;;  %v2307_v0 = vmax.f32 %v2275_v14, 0.0  ;;  %v5666_v14 = vld [vmem:[#allocation48_spill] sm:$0xff]  ;;  %v5667_v48 = vld [vmem:[#allocation51_spill] sm:$0xff] }
 0x166   : > { %v4636_v43 = vsel %vm1272_vm6, %v1396_v36, 0.0  ;;  %v4650_v20 = vsel %vm1551_vm3, %v5665_v52, %v5664_v17  ;;  %v2308_v30 = vmax.f32 %v2276_v49, 0.0  ;;  %v4652_v16 = vsel %vm1309_vm7, %v1575_v6, 0.0  ;;  %v5668_v6 = vld [vmem:[#allocation56_spill] sm:$0xff]  ;;  %v842_v52 = vpop.f32.mrf.mxu2 }
 0x167   : > { %v1706_v23 = vmul.f32 %v3788_v40, %v4222_v11  ;;  %v1803_v9 = vmul.f32 %v3798_v50, %v4226_v44  ;;  %v1804_v60 = vmul.f32 %v3798_v50, %v4308_v29  ;;  %v1868_v63 = vmul.f32 %v3825_v2, %v4407_v13 }
 0x168   : > { %v2329_v36 = vpack.c.bf16 %v2308_v30, %v2307_v0  ;;  %v1770_v49 = vadd.f32 %v5666_v14, %v1705_v34  ;;  %v1869_v21 = vmul.f32 %v3825_v2, %v4368_v19  ;;  %v1966_v58 = vmul.f32 %v3831_v4, %v4392_v37  ;;  %v5669_v30 = vld [vmem:[#allocation60_spill] sm:$0xff] }
 0x169   : > { %v1771_v11 = vadd.f32 %v5667_v48, %v1706_v23  ;;  %v1933_v17 = vadd.f32 %v5668_v6, %v1868_v63  ;;  %v1967_v44 = vmul.f32 %v3831_v4, %v4418_v24  ;;  %v2031_v29 = vmul.f32 %v3833_v5, %v4636_v43  ;;  %v804_v23 = vpop.f32.mrf.mxu0 }
 0x16a   : > { %2461 = vmatmul.bf16.gmra.mxu3 %v2329_v36  ;;  %v1835_v0 = vadd.f32 %v1803_v9, %v1770_v49  ;;  %v1934_v34 = vadd.f32 %v5669_v30, %v1869_v21  ;;  %v2032_v14 = vmul.f32 %v3833_v5, %v4628_v61  ;;  %v2064_v22 = vmul.f32 %v3803_v53, %v4380_v47  ;;  %v4689_v49 = vld [vmem:[%s5476_s4] ss:$0 sm:$0xff] }
 0x16b   : > { %v1836_v48 = vadd.f32 %v1804_v60, %v1771_v11  ;;  %v1998_v63 = vadd.f32 %v1966_v58, %v1933_v17  ;;  %v2065_v6 = vmul.f32 %v3803_v53, %v4435_v39  ;;  %v2129_v35 = vmul.f32 %v4061_v1, %v4650_v20 }
 0x16c   : > { %v1999_v46 = vadd.f32 %v1967_v44, %v1934_v34  ;;  %v2096_v36 = vadd.f32 %v2064_v22, %v2031_v29  ;;  %v2130_v9 = vmul.f32 %v4061_v1, %v4652_v16  ;;  %v843_v47 = vadd.f32 %v4689_v49, %v842_v52 }
 0x16d   : > { %v2097_v60 = vadd.f32 %v2065_v6, %v2032_v14  ;;  %v2193_v21 = vadd.f32 %v1998_v63, %v1835_v0  ;;  %v805_v58 = vadd.f32 %v4689_v49, %v804_v23  ;;  %v920_v11 = vadd.s32 208, %v3770_v27 }
 0x16e   : > { %v2161_v17 = vadd.f32 %v2129_v35, %v2096_v36  ;;  %v2194_v30 = vadd.f32 %v1999_v46, %v1836_v48  ;;  %v4694_v44 = vmax.f32 %v843_v47, 0.0  ;;  %v921_v22 = vadd.s32 216, %v3770_v27  ;;  %v5683_v36 = vld [vmem:[#allocation58_spill] sm:$0xff] }
 0x16f   : > { %v2162_v29 = vadd.f32 %v2130_v9, %v2097_v60  ;;  %v4697_v34 = vmax.f32 %v805_v58, 0.0  ;;  %v1252_v25 = vand.u32 15, %v920_v11  ;;  %v5670_v41 = vrot.slane %v4467_v55, 7 }
 0x170   : > { %v5671_v52 = vrot.slane %v4415_v32, 7  ;;  %v2225_v14 = vadd.f32 %v2193_v21, %v2161_v17  ;;  %v4711_v23 = vmul.f32 %v3791_v42, %v4694_v44  ;;  %v4715_v63 = vmul.f32 %v3800_v51, %v4694_v44 }
 0x171   : > { %v2226_v48 = vadd.f32 %v2194_v30, %v2162_v29  ;;  %v4722_v9 = vmul.f32 %v3791_v42, %v4697_v34  ;;  %v4726_v47 = vmul.f32 %v3800_v51, %v4697_v34  ;;  %v1253_v60 = vand.u32 15, %v921_v22 }
 0x172   : > { %v4705_v0 = vsel %vm1370_vm1, %v5671_v52, %v5670_v41  ;;  %5672 = vst [vmem:[#allocation54_spill] sm:$0xff] %v4711_v23  ;;  %v2261_v41 = vadd.f32 %v4113_v54, %v2225_v14  ;;  %vm1288_vm8 = vcmp.ne.s32.totalorder %v1252_v25, 0  ;;  %v5675_v58 = vmov %v5671_v52  ;;  %v844_v23 = vpop.f32.mrf.mxu2 }
 0x173   : > { %5673 = vst [vmem:[#allocation48_spill] sm:$0xff] %v4715_v63  ;;  %v2262_v21 = vadd.f32 %v4113_v54, %v2226_v48  ;;  %v5676_v11 = vrot.slane %v4357_v15, 7  ;;  %v5677_v30 = vrot.slane %v4530_v3, 1  ;;  %v5678_v29 = vrot.slane %v4467_v55, 1 }
 0x174   : > { %5674 = vst [vmem:[#allocation51_spill] sm:$0xff] %v4722_v9  ;;  %v2293_v14 = vmax.f32 %v2261_v41, 0.0  ;;  %vm1325_vm9 = vcmp.ne.s32.totalorder %v1253_v60, 15  ;;  %v5680_v48 = vrot.slane %v4415_v32, 1  ;;  %v1721_v35 = vmul.f32 %v3788_v40, %v4233_v28 }
 0x175   : > { %v1380_v17 = vsel %vm1370_vm1, %v5676_v11, %v5675_v58  ;;  %v1559_v52 = vsel %vm1551_vm3, %v5678_v29, %v5677_v30  ;;  %v5679_v25 = vmov %v5678_v29  ;;  %v2294_v58 = vmax.f32 %v2262_v21, 0.0 }
 0x176   : > { %v4741_v22 = vsel %vm1288_vm8, %v1380_v17, 0.0  ;;  %v4749_v15 = vsel %vm1551_vm3, %v5680_v48, %v5679_v25  ;;  %v4751_v11 = vsel %vm1325_vm9, %v1559_v52, 0.0  ;;  %v1722_v41 = vmul.f32 %v3788_v40, %v4271_v38  ;;  %v5681_v52 = vld [vmem:[#allocation49_spill] sm:$0xff] }
 0x177   : > { %v1819_v60 = vmul.f32 %v3798_v50, %v4275_v26  ;;  %v1820_v17 = vmul.f32 %v3798_v50, %v4352_v59  ;;  %v1884_v30 = vmul.f32 %v3825_v2, %v4550_v8  ;;  %v1885_v21 = vmul.f32 %v3825_v2, %v4496_v33  ;;  %v5682_v48 = vld [vmem:[#allocation53_spill] sm:$0xff] }
 0x178   : > { %v2322_v29 = vpack.c.bf16 %v2294_v58, %v2293_v14  ;;  %v1786_v25 = vadd.f32 %v5681_v52, %v1721_v35  ;;  %v1787_v28 = vadd.f32 %v5682_v48, %v1722_v41  ;;  %v1982_v38 = vmul.f32 %v3831_v4, %v4527_v56 }
 0x179   : > { %v1949_v6 = vadd.f32 %v5683_v36, %v1884_v30  ;;  %v1950_v26 = vadd.f32 %v4378_v10, %v1885_v21  ;;  %v1983_v59 = vmul.f32 %v3831_v4, %v4552_v45  ;;  %v2047_v46 = vmul.f32 %v3833_v5, %v4741_v22 }
 0x17a   : > { %2426 = vmatmul.bf16.gmra.mxu1 %v2322_v29  ;;  %v1851_v14 = vadd.f32 %v1819_v60, %v1786_v25  ;;  %v1852_v58 = vadd.f32 %v1820_v17, %v1787_v28  ;;  %v2048_v35 = vmul.f32 %v3833_v5, %v4705_v0  ;;  %v2080_v41 = vmul.f32 %v3803_v53, %v4415_v32 }
 0x17b   : > { %v2014_v52 = vadd.f32 %v1982_v38, %v1949_v6  ;;  %v2015_v36 = vadd.f32 %v1983_v59, %v1950_v26  ;;  %v2081_v10 = vmul.f32 %v3803_v53, %v4467_v55  ;;  %v2145_v30 = vmul.f32 %v4061_v1, %v4749_v15  ;;  %v5684_v59 = vld [vmem:[#allocation74_spill] sm:$0xff] }
 0x17c   : > { %v2112_v21 = vadd.f32 %v2080_v41, %v2047_v46  ;;  %v2146_v29 = vmul.f32 %v4061_v1, %v4751_v11  ;;  %v845_v60 = vadd.f32 %v4689_v49, %v844_v23  ;;  %v906_v17 = vadd.s32 96, %v3770_v27 }
 0x17d   : > { %v2113_v25 = vadd.f32 %v2081_v10, %v2048_v35  ;;  %v2209_v48 = vadd.f32 %v2014_v52, %v1851_v14  ;;  %v2210_v28 = vadd.f32 %v2015_v36, %v1852_v58  ;;  %v907_v32 = vadd.s32 104, %v3770_v27 }
 0x17e   : > { %v2177_v6 = vadd.f32 %v2145_v30, %v2112_v21  ;;  %v4788_v38 = vmax.f32 %v845_v60, 0.0  ;;  %v1238_v26 = vand.u32 15, %v906_v17  ;;  %v5685_v9 = vrot.slane %v5684_v59, 7  ;;  %v847_v21 = vpop.f32.mrf.mxu2 }
 0x17f   : > { %v5686_v46 = vrot.slane %v4486_v57, 7  ;;  %v2178_v23 = vadd.f32 %v2146_v29, %v2113_v25  ;;  %v1239_v63 = vand.u32 15, %v907_v32  ;;  %v5688_v14 = vrot.slane %v4435_v39, 7 }
 0x180   : > { %v5689_v52 = vrot.slane %v4597_v7, 1  ;;  %v5690_v36 = vrot.slane %v5684_v59, 1  ;;  %v2241_v30 = vadd.f32 %v2209_v48, %v2177_v6  ;;  %v4814_v29 = vmul.f32 %v3791_v42, %v4788_v38 }
 0x181   : > { %v4796_v41 = vsel %vm1370_vm1, %v5686_v46, %v5685_v9  ;;  %v5687_v35 = vmov %v5686_v46  ;;  %v2242_v39 = vadd.f32 %v2210_v28, %v2178_v23  ;;  %v4818_v60 = vmul.f32 %v3800_v51, %v4788_v38 }
 0x182   : > { %v1394_v58 = vsel %vm1370_vm1, %v5688_v14, %v5687_v35  ;;  %v1573_v10 = vsel %vm1551_vm3, %v5690_v36, %v5689_v52  ;;  %5691 = vst [vmem:[#allocation56_spill] sm:$0xff] %v4814_v29  ;;  %vm1274_vm10 = vcmp.ne.s32.totalorder %v1238_v26, 0  ;;  %vm1311_vm11 = vcmp.ne.s32.totalorder %v1239_v63, 15 }
 0x183   : > { %v2277_v17 = vadd.f32 %v4113_v54, %v2241_v30  ;;  %v4821_v25 = vsel %vm1274_vm10, %v1394_v58, 0.0  ;;  %v5692_v48 = vmov %v5690_v36  ;;  %v5693_v32 = vrot.slane %v4486_v57, 1  ;;  %v5694_v36 = vld [vmem:[#allocation55_spill] sm:$0xff] }
 0x184   : > { %v4831_v42 = vsel %vm1311_vm11, %v1573_v10, 0.0  ;;  %v2278_v28 = vadd.f32 %v4113_v54, %v2242_v39  ;;  %v1707_v26 = vmul.f32 %v3788_v40, %v4407_v13  ;;  %v1708_v63 = vmul.f32 %v3788_v40, %v4368_v19  ;;  %v5695_v13 = vld [vmem:[#allocation59_spill] sm:$0xff] }
 0x185   : > { %v4829_v6 = vsel %vm1551_vm3, %v5693_v32, %v5692_v48  ;;  %v1805_v46 = vmul.f32 %v3798_v50, %v4392_v37  ;;  %v2309_v23 = vmax.f32 %v2277_v17, 0.0  ;;  %v1806_v35 = vmul.f32 %v3798_v50, %v4418_v24  ;;  %v5696_v39 = vld [vmem:[#allocation63_spill] sm:$0xff] }
 0x186   : > { %v1870_v14 = vmul.f32 %v3825_v2, %v4636_v43  ;;  %v1871_v58 = vmul.f32 %v3825_v2, %v4628_v61  ;;  %v2310_v52 = vmax.f32 %v2278_v28, 0.0  ;;  %v1772_v10 = vadd.f32 %v5694_v36, %v1707_v26  ;;  %v5697_v17 = vld [vmem:[#allocation67_spill] sm:$0xff] }
 0x187   : > { %v1773_v30 = vadd.f32 %v5695_v13, %v1708_v63  ;;  %v1968_v19 = vmul.f32 %v3831_v4, %v4650_v20  ;;  %v1969_v24 = vmul.f32 %v3831_v4, %v4652_v16  ;;  %v2033_v32 = vmul.f32 %v3833_v5, %v4821_v25 }
 0x188   : > { %v1935_v37 = vadd.f32 %v5696_v39, %v1870_v14  ;;  %v1936_v48 = vadd.f32 %v5697_v17, %v1871_v58  ;;  %v2330_v9 = vpack.c.bf16 %v2310_v52, %v2309_v23  ;;  %v1837_v28 = vadd.f32 %v1805_v46, %v1772_v10 }
 0x189   : > { %v1838_v29 = vadd.f32 %v1806_v35, %v1773_v30  ;;  %v2034_v26 = vmul.f32 %v3833_v5, %v4796_v41  ;;  %v2066_v14 = vmul.f32 %v3803_v53, %v4486_v57  ;;  %v2067_v58 = vmul.f32 %v3803_v53, %v5684_v59 }
 0x18a   : > { %v2000_v63 = vadd.f32 %v1968_v19, %v1935_v37  ;;  %v2001_v36 = vadd.f32 %v1969_v24, %v1936_v48  ;;  %2466 = vmatmul.bf16.gmra.mxu3 %v2330_v9  ;;  %v2131_v13 = vmul.f32 %v4061_v1, %v4829_v6  ;;  %v2132_v23 = vmul.f32 %v4061_v1, %v4831_v42 }
 0x18b   : > { %v848_v46 = vadd.f32 %v4689_v49, %v847_v21  ;;  %v926_v35 = vadd.s32 256, %v3770_v27  ;;  %v2098_v52 = vadd.f32 %v2066_v14, %v2033_v32  ;;  %v2099_v10 = vadd.f32 %v2067_v58, %v2034_v26 }
 0x18c   : > { %v2195_v30 = vadd.f32 %v2000_v63, %v1837_v28  ;;  %v2196_v19 = vadd.f32 %v2001_v36, %v1838_v29  ;;  %v922_v37 = vadd.s32 224, %v3770_v27  ;;  %v923_v9 = vadd.s32 232, %v3770_v27 }
 0x18d   : > { %v4868_v39 = vmax.f32 %v848_v46, 0.0  ;;  %v1258_v57 = vand.u32 15, %v926_v35  ;;  %v2163_v17 = vadd.f32 %v2131_v13, %v2098_v52  ;;  %v2164_v48 = vadd.f32 %v2132_v23, %v2099_v10 }
 0x18e   : > { %v5698_v24 = vrot.slane %v4595_v18, 7  ;;  %v5699_v1 = vrot.slane %v4530_v3, 7  ;;  %v5701_v29 = vrot.slane %v4467_v55, 7  ;;  %v1254_v23 = vand.u32 15, %v922_v37 }
 0x18f   : > { %vm1294_vm12 = vcmp.ne.s32.totalorder %v1258_v57, 0  ;;  %v5529_v26 = vrot.slane %v4868_v39, 7  ;;  %v1925_v36 = vmul.f32 %v3800_v51, %v4868_v39  ;;  %v2227_v14 = vadd.f32 %v2195_v30, %v2163_v17 }
 0x190   : > { %v4878_v21 = vsel %vm1370_vm1, %v5699_v1, %v5698_v24  ;;  %v5700_v32 = vmov %v5699_v1  ;;  %v2228_v58 = vadd.f32 %v2196_v19, %v2164_v48  ;;  %v4892_v13 = vmul.f32 %v3803_v53, %v4868_v39 }
 0x191   : > { %v1378_v28 = vsel %vm1370_vm1, %v5701_v29, %v5700_v32  ;;  %v5703_v55 = vrot.slane %v4788_v38, 7  ;;  %v1255_v35 = vand.u32 15, %v923_v9  ;;  %v5704_v52 = vrot.slane %v4694_v44, 1 }
 0x192   : > { %5702 = vst [vmem:[#allocation60_spill] sm:$0xff] %v4892_v13  ;;  %v5705_v10 = vrot.slane %v4595_v18, 1  ;;  %v5707_v57 = vrot.slane %v4530_v3, 1  ;;  %v2263_v17 = vadd.f32 %v4113_v54, %v2227_v14  ;;  %v2264_v48 = vadd.f32 %v4113_v54, %v2228_v58  ;;  %v5709_v58 = vld [vmem:[#allocation57_spill] sm:$0xff] }
 0x193   : > { %v1374_v46 = vsel %vm1370_vm1, %v5703_v55, %v5529_v26  ;;  %vm1290_vm13 = vcmp.ne.s32.totalorder %v1254_v23, 0  ;;  %vm1327_vm14 = vcmp.ne.s32.totalorder %v1255_v35, 15  ;;  %v1723_v32 = vmul.f32 %v3788_v40, %v4550_v8 }
 0x194   : > { %v1557_v30 = vsel %vm1551_vm3, %v5705_v10, %v5704_v52  ;;  %v5706_v19 = vmov %v5705_v10  ;;  %v4916_v9 = vsel %vm1294_vm12, %v1374_v46, 0.0  ;;  %v4920_v1 = vsel %vm1290_vm13, %v1378_v28, 0.0  ;;  %v5710_v10 = vld [vmem:[#allocation61_spill] sm:$0xff] }
 0x195   : > { %v4912_v37 = vsel %vm1551_vm3, %v5707_v57, %v5706_v19  ;;  %v1892_v24 = vmul.f32 %v3825_v2, %v4916_v9  ;;  %v2295_v29 = vmax.f32 %v2263_v17, 0.0  ;;  %v2296_v55 = vmax.f32 %v2264_v48, 0.0  ;;  %v5711_v48 = vld [vmem:[#allocation65_spill] sm:$0xff] }
 0x196   : > { %v4924_v52 = vsel %vm1327_vm14, %v1557_v30, 0.0  ;;  %v1724_v14 = vmul.f32 %v3788_v40, %v4496_v33  ;;  %v1788_v23 = vadd.f32 %v5709_v58, %v1723_v32  ;;  %v1821_v46 = vmul.f32 %v3798_v50, %v4527_v56  ;;  %v5712_v32 = vld [vmem:[#allocation69_spill] sm:$0xff] }
 0x197   : > { %v4928_v54 = vadd.f32 %v1925_v36, %v1892_v24  ;;  %v1822_v28 = vmul.f32 %v3798_v50, %v4552_v45  ;;  %v2323_v35 = vpack.c.bf16 %v2296_v55, %v2295_v29  ;;  %v1886_v30 = vmul.f32 %v3825_v2, %v4741_v22  ;;  %v849_v45 = vpop.f32.mrf.mxu2 }
 0x198   : > { %v1789_v8 = vadd.f32 %v5710_v10, %v1724_v14  ;;  %v1887_v19 = vmul.f32 %v3825_v2, %v4705_v0  ;;  %v1853_v33 = vadd.f32 %v1821_v46, %v1788_v23  ;;  %v1984_v36 = vmul.f32 %v3831_v4, %v4749_v15  ;;  %v4954_v23 = vld [vmem:[#allocation10 + $0x8] ss:$0 sm:$0xff] }
 0x199   : > { %5708 = vst [vmem:[#allocation49_spill] sm:$0xff] %v4928_v54  ;;  %v1985_v57 = vmul.f32 %v3831_v4, %v4751_v11  ;;  %v2049_v56 = vmul.f32 %v3833_v5, %v4920_v1  ;;  %2431 = vmatmul.bf16.gmra.mxu1 %v2323_v35  ;;  %v1951_v24 = vadd.f32 %v5711_v48, %v1886_v30  ;;  %v908_v30 = vadd.s32 112, %v3770_v27 }
 0x19a   : > { %v1854_v17 = vadd.f32 %v1822_v28, %v1789_v8  ;;  %v1952_v29 = vadd.f32 %v5712_v32, %v1887_v19  ;;  %v2050_v55 = vmul.f32 %v3833_v5, %v4878_v21  ;;  %v2082_v14 = vmul.f32 %v3803_v53, %v4530_v3 }
 0x19b   : > { %v2083_v58 = vmul.f32 %v3803_v53, %v4595_v18  ;;  %v2147_v46 = vmul.f32 %v4954_v23, %v4912_v37  ;;  %v2148_v28 = vmul.f32 %v4954_v23, %v4924_v52  ;;  %v2016_v35 = vadd.f32 %v1984_v36, %v1951_v24 }
 0x19c   : > { %v2017_v10 = vadd.f32 %v1985_v57, %v1952_v29  ;;  %v850_v8 = vadd.f32 %v4689_v49, %v849_v45  ;;  %v2114_v19 = vadd.f32 %v2082_v14, %v2049_v56  ;;  %v909_v3 = vadd.s32 120, %v3770_v27 }
 0x19d   : > { %v2115_v48 = vadd.f32 %v2083_v58, %v2050_v55  ;;  %v5713_v32 = vrot.slane %v4697_v34, 7  ;;  %v5714_v63 = vrot.slane %v4597_v7, 7  ;;  %v2211_v54 = vadd.f32 %v2016_v35, %v1853_v33 }
 0x19e   : > { %v2212_v13 = vadd.f32 %v2017_v10, %v1854_v17  ;;  %v4971_v36 = vmax.f32 %v850_v8, 0.0  ;;  %v1240_v57 = vand.u32 15, %v908_v30  ;;  %v2179_v49 = vadd.f32 %v2147_v46, %v2114_v19  ;;  %v5720_v30 = vld [vmem:[#allocation30_spill] sm:$0xff] }
 0x19f   : > { %v4969_v26 = vsel %vm1370_vm1, %v5714_v63, %v5713_v32  ;;  %v2180_v45 = vadd.f32 %v2148_v28, %v2115_v48  ;;  %v1241_v24 = vand.u32 15, %v909_v3  ;;  %v5715_v56 = vmov %v5714_v63  ;;  %v5717_v28 = vld [vmem:[#allocation27_spill] sm:$0xff]  ;;  %v5009_v48 = vld [vmem:[%s5478_s6] ss:$0 sm:$0xff] }
 0x1a0   : > { %v5716_v29 = vrot.slane %v5684_v59, 7  ;;  %v1367_v14 = vrot.slane %v4971_v36, 7  ;;  %v1926_v33 = vmul.f32 %v3800_v51, %v4971_v36  ;;  %v4985_v17 = vmul.f32 %v3803_v53, %v4971_v36 }
 0x1a1   : > { %v2243_v58 = vadd.f32 %v2211_v54, %v2179_v49  ;;  %v2244_v46 = vadd.f32 %v2212_v13, %v2180_v45  ;;  %vm1276_vm15 = vcmp.ne.s32.totalorder %v1240_v57, 0  ;;  %vm1313_vm0 = vcmp.ne.s32.totalorder %v1241_v24, 15 }
 0x1a2   : > { %v1392_v55 = vsel %vm1370_vm1, %v5716_v29, %v5715_v56  ;;  %v4990_v59 = vsel %vm1370_vm1, %v1367_v14, %v5717_v28  ;;  %v5719_v35 = vrot.slane %v4868_v39, 7  ;;  %v5721_v19 = vrot.slane %v5720_v30, 1 }
 0x1a3   : > { %5718 = vst [vmem:[#allocation53_spill] sm:$0xff] %v4990_v59  ;;  %v4998_v8 = vsel %vm1276_vm15, %v1392_v55, 0.0  ;;  %v5722_v54 = vrot.slane %v4697_v34, 1  ;;  %v2279_v3 = vadd.f32 %v5009_v48, %v2243_v58  ;;  %v2280_v32 = vadd.f32 %v5009_v48, %v2244_v46 }
 0x1a4   : > { %v4996_v10 = vsel %vm1370_vm1, %v5719_v35, %v1367_v14  ;;  %v5724_v45 = vrot.slane %v4597_v7, 1  ;;  %v1709_v29 = vmul.f32 %v3788_v40, %v4636_v43  ;;  %v1710_v55 = vmul.f32 %v3788_v40, %v4628_v61 }
 0x1a5   : > { %v1571_v13 = vsel %vm1551_vm3, %v5722_v54, %v5721_v19  ;;  %v1893_v57 = vmul.f32 %v3825_v2, %v4996_v10  ;;  %v5723_v49 = vmov %v5722_v54  ;;  %v1807_v14 = vmul.f32 %v3798_v50, %v4650_v20  ;;  %v5726_v54 = vld [vmem:[#allocation62_spill] sm:$0xff] }
 0x1a6   : > { %v5021_v24 = vsel %vm1551_vm3, %v5724_v45, %v5723_v49  ;;  %v5023_v56 = vsel %vm1313_vm0, %v1571_v13, 0.0  ;;  %v2311_v58 = vmax.f32 %v2279_v3, 0.0  ;;  %v2312_v46 = vmax.f32 %v2280_v32, 0.0  ;;  %v5727_v13 = vld [vmem:[#allocation66_spill] sm:$0xff] }
 0x1a7   : > { %v5031_v35 = vadd.f32 %v1926_v33, %v1893_v57  ;;  %v1808_v19 = vmul.f32 %v3798_v50, %v4652_v16  ;;  %v1774_v49 = vadd.f32 %v5726_v54, %v1709_v29  ;;  %v1775_v45 = vadd.f32 %v5727_v13, %v1710_v55  ;;  %v5728_v57 = vld [vmem:[#allocation71_spill] sm:$0xff]  ;;  %v5729_v55 = vld [vmem:[#allocation76_spill] sm:$0xff] }
 0x1a8   : > { %v1872_v43 = vmul.f32 %v3825_v2, %v4821_v25  ;;  %v1873_v61 = vmul.f32 %v3825_v2, %v4796_v41  ;;  %v2331_v63 = vpack.c.bf16 %v2312_v46, %v2311_v58  ;;  %v1970_v20 = vmul.f32 %v3831_v4, %v4829_v6 }
 0x1a9   : > { %5725 = vst [vmem:[#allocation58_spill] sm:$0xff] %v5031_v35  ;;  %v1971_v33 = vmul.f32 %v3831_v4, %v4831_v42  ;;  %v2035_v16 = vmul.f32 %v3833_v5, %v4998_v8  ;;  %v1839_v3 = vadd.f32 %v1807_v14, %v1774_v49  ;;  %v1840_v32 = vadd.f32 %v1808_v19, %v1775_v45 }
 0x1aa   : > { %v1937_v29 = vadd.f32 %v5728_v57, %v1872_v43  ;;  %v1938_v54 = vadd.f32 %v5729_v55, %v1873_v61  ;;  %2471 = vmatmul.bf16.gmra.mxu3 %v2331_v63  ;;  %v2036_v13 = vmul.f32 %v3833_v5, %v4969_v26  ;;  %v2068_v58 = vmul.f32 %v3803_v53, %v4597_v7 }
 0x1ab   : > { %v2069_v46 = vmul.f32 %v3803_v53, %v4697_v34  ;;  %v2133_v51 = vmul.f32 %v4954_v23, %v5021_v24  ;;  %v2134_v19 = vmul.f32 %v4954_v23, %v5023_v56  ;;  %v924_v49 = vadd.s32 240, %v3770_v27 }
 0x1ac   : > { %v2002_v35 = vadd.f32 %v1970_v20, %v1937_v29  ;;  %v2003_v14 = vadd.f32 %v1971_v33, %v1938_v54  ;;  %v2100_v63 = vadd.f32 %v2068_v58, %v2035_v16  ;;  %v925_v43 = vadd.s32 248, %v3770_v27 }
 0x1ad   : > { %v2101_v45 = vadd.f32 %v2069_v46, %v2036_v13  ;;  %v5730_v61 = vrot.slane %v4788_v38, 7  ;;  %v5731_v7 = vrot.slane %v4694_v44, 7  ;;  %v1256_v33 = vand.u32 15, %v924_v49 }
 0x1ae   : > { %v2197_v55 = vadd.f32 %v2002_v35, %v1839_v3  ;;  %v2198_v20 = vadd.f32 %v2003_v14, %v1840_v32  ;;  %v5733_v54 = vrot.slane %v4595_v18, 7  ;;  %v2165_v13 = vadd.f32 %v2133_v51, %v2100_v63 }
 0x1af   : > { %v5067_v57 = vsel %vm1370_vm1, %v5731_v7, %v5730_v61  ;;  %v5732_v29 = vmov %v5731_v7  ;;  %v2166_v58 = vadd.f32 %v2134_v19, %v2101_v45  ;;  %v1257_v46 = vand.u32 15, %v925_v43  ;;  %v5739_v45 = vld [vmem:[#allocation68_spill] sm:$0xff] }
 0x1b0   : > { %v1376_v16 = vsel %vm1370_vm1, %v5733_v54, %v5732_v29  ;;  %v5734_v28 = vrot.slane %v4868_v39, 1  ;;  %v5735_v59 = vrot.slane %v4788_v38, 1  ;;  %vm1292_vm2 = vcmp.ne.s32.totalorder %v1256_v33, 0 }
 0x1b1   : > { %v5737_v3 = vrot.slane %v4694_v44, 1  ;;  %v1725_v51 = vmul.f32 %v3788_v40, %v4741_v22  ;;  %v1726_v32 = vmul.f32 %v3788_v40, %v4705_v0  ;;  %v2229_v14 = vadd.f32 %v2197_v55, %v2165_v13 }
 0x1b2   : > { %v1555_v61 = vsel %vm1551_vm3, %v5735_v59, %v5734_v28  ;;  %v5736_v35 = vmov %v5735_v59  ;;  %v2230_v19 = vadd.f32 %v2198_v20, %v2166_v58  ;;  %vm1329_vm4 = vcmp.ne.s32.totalorder %v1257_v46, 15  ;;  %v5738_v59 = vld [vmem:[#allocation64_spill] sm:$0xff]  ;;  %v5740_v46 = vld [vmem:[#allocation73_spill] sm:$0xff] }
 0x1b3   : > { %v5087_v18 = vsel %vm1551_vm3, %v5737_v3, %v5736_v35  ;;  %v5093_v49 = vsel %vm1292_vm2, %v1376_v16, 0.0  ;;  %v5095_v28 = vsel %vm1329_vm4, %v1555_v61, 0.0  ;;  %v1790_v63 = vadd.f32 %v5738_v59, %v1725_v51 }
 0x1b4   : > { %v1791_v43 = vadd.f32 %v5739_v45, %v1726_v32  ;;  %v1823_v7 = vmul.f32 %v3798_v50, %v4749_v15  ;;  %v2265_v33 = vadd.f32 %v5009_v48, %v2229_v14  ;;  %v2266_v22 = vadd.f32 %v5009_v48, %v2230_v19 }
 0x1b5   : > { %v1824_v0 = vmul.f32 %v3798_v50, %v4751_v11  ;;  %v1888_v55 = vmul.f32 %v3825_v2, %v4920_v1  ;;  %v1889_v29 = vmul.f32 %v3825_v2, %v4878_v21  ;;  %v1986_v54 = vmul.f32 %v3831_v4, %v4912_v37 }
 0x1b6   : > { %v1855_v20 = vadd.f32 %v1823_v7, %v1790_v63  ;;  %v1987_v15 = vmul.f32 %v3831_v4, %v4924_v52  ;;  %v2297_v16 = vmax.f32 %v2265_v33, 0.0  ;;  %v2298_v13 = vmax.f32 %v2266_v22, 0.0  ;;  %v5741_v22 = vld [vmem:[#allocation31_spill] sm:$0xff] }
 0x1b7   : > { %v1856_v58 = vadd.f32 %v1824_v0, %v1791_v43  ;;  %v1953_v61 = vadd.f32 %v5740_v46, %v1888_v55  ;;  %v1954_v11 = vadd.f32 %v4608_v12, %v1889_v29  ;;  %v2051_v35 = vmul.f32 %v3833_v5, %v5093_v49 }
 0x1b8   : > { %v2052_v3 = vmul.f32 %v3833_v5, %v5067_v57  ;;  %v2084_v51 = vmul.f32 %v3803_v53, %v4694_v44  ;;  %v2324_v32 = vpack.c.bf16 %v2298_v13, %v2297_v16  ;;  %v2085_v19 = vmul.f32 %v3803_v53, %v4788_v38 }
 0x1b9   : > { %v2018_v14 = vadd.f32 %v1986_v54, %v1953_v61  ;;  %v2149_v59 = vmul.f32 %v4954_v23, %v5087_v18  ;;  %v2019_v63 = vadd.f32 %v1987_v15, %v1954_v11  ;;  %v2150_v12 = vmul.f32 %v4954_v23, %v5095_v28  ;;  %v5746_v11 = vld [vmem:[#allocation34_spill] sm:$0xff] }
 0x1ba   : > { %v2116_v45 = vadd.f32 %v2084_v51, %v2051_v35  ;;  %v910_v43 = vadd.s32 128, %v3770_v27  ;;  %2436 = vmatmul.bf16.gmra.mxu1 %v2324_v32  ;;  %v2117_v7 = vadd.f32 %v2085_v19, %v2052_v3  ;;  %v911_v44 = vadd.s32 136, %v3770_v27 }
 0x1bb   : > { %v2213_v33 = vadd.f32 %v2018_v14, %v1855_v20  ;;  %v5742_v0 = vrot.slane %v5741_v22, 7  ;;  %v5743_v55 = vrot.slane %v5720_v30, 7  ;;  %v2214_v54 = vadd.f32 %v2019_v63, %v1856_v58 }
 0x1bc   : > { %v2181_v29 = vadd.f32 %v2149_v59, %v2116_v45  ;;  %v1242_v15 = vand.u32 15, %v910_v43  ;;  %v5745_v13 = vrot.slane %v4697_v34, 7  ;;  %v2182_v46 = vadd.f32 %v2150_v12, %v2117_v7 }
 0x1bd   : > { %v5135_v38 = vsel %vm1370_vm1, %v5743_v55, %v5742_v0  ;;  %v5744_v16 = vmov %v5743_v55  ;;  %v1243_v61 = vand.u32 15, %v911_v44  ;;  %v5747_v35 = vrot.slane %v5746_v11, 1  ;;  %v5751_v44 = vld [vmem:[#allocation70_spill] sm:$0xff]  ;;  %v5752_v0 = vld [vmem:[#allocation75_spill] sm:$0xff] }
 0x1be   : > { %v1390_v20 = vsel %vm1370_vm1, %v5745_v13, %v5744_v16  ;;  %v5748_v3 = vrot.slane %v5741_v22, 1  ;;  %v5750_v58 = vrot.slane %v5720_v30, 1  ;;  %v2245_v34 = vadd.f32 %v2213_v33, %v2181_v29 }
 0x1bf   : > { %vm1278_vm5 = vcmp.ne.s32.totalorder %v1242_v15, 0  ;;  %v1711_v19 = vmul.f32 %v3788_v40, %v4821_v25  ;;  %v1712_v59 = vmul.f32 %v3788_v40, %v4796_v41  ;;  %v2246_v63 = vadd.f32 %v2214_v54, %v2182_v46 }
 0x1c0   : > { %v1569_v51 = vsel %vm1551_vm3, %v5748_v3, %v5747_v35  ;;  %v5749_v32 = vmov %v5748_v3  ;;  %vm1315_vm1 = vcmp.ne.s32.totalorder %v1243_v61, 15  ;;  %v5161_v45 = vsel %vm1278_vm5, %v1390_v20, 0.0 }
 0x1c1   : > { %v5155_v14 = vsel %vm1551_vm3, %v5750_v58, %v5749_v32  ;;  %v1809_v12 = vmul.f32 %v3798_v50, %v4829_v6  ;;  %v2281_v43 = vadd.f32 %v5009_v48, %v2245_v34  ;;  %v5166_v7 = vsel %vm1315_vm1, %v1569_v51, 0.0 }
 0x1c2   : > { %v1776_v33 = vadd.f32 %v5751_v44, %v1711_v19  ;;  %v1777_v55 = vadd.f32 %v5752_v0, %v1712_v59  ;;  %v2282_v25 = vadd.f32 %v5009_v48, %v2246_v63  ;;  %v1810_v41 = vmul.f32 %v3798_v50, %v4831_v42 }
 0x1c3   : > { %v1874_v29 = vmul.f32 %v3825_v2, %v4998_v8  ;;  %v1875_v54 = vmul.f32 %v3825_v2, %v4969_v26  ;;  %v2313_v6 = vmax.f32 %v2281_v43, 0.0  ;;  %v1972_v16 = vmul.f32 %v3831_v4, %v5021_v24 }
 0x1c4   : > { %v1841_v15 = vadd.f32 %v1809_v12, %v1776_v33  ;;  %v1973_v13 = vmul.f32 %v3831_v4, %v5023_v56  ;;  %v2314_v20 = vmax.f32 %v2282_v25, 0.0  ;;  %v1842_v46 = vadd.f32 %v1810_v41, %v1777_v55 }
 0x1c5   : > { %v1939_v61 = vadd.f32 %v4618_v31, %v1874_v29  ;;  %v1940_v42 = vadd.f32 %v4726_v47, %v1875_v54  ;;  %v2037_v35 = vmul.f32 %v3833_v5, %v5161_v45  ;;  %v2038_v3 = vmul.f32 %v3833_v5, %v5135_v38 }
 0x1c6   : > { %v2070_v51 = vmul.f32 %v3803_v53, %v5720_v30  ;;  %v2071_v32 = vmul.f32 %v3803_v53, %v5741_v22  ;;  %v2332_v58 = vpack.c.bf16 %v2314_v20, %v2313_v6  ;;  %v2135_v31 = vmul.f32 %v4954_v23, %v5155_v14  ;;  %v5753_v30 = vld [vmem:[#allocation28_spill] sm:$0xff] }
 0x1c7   : > { %v2004_v34 = vadd.f32 %v1972_v16, %v1939_v61  ;;  %v2005_v19 = vadd.f32 %v1973_v13, %v1940_v42  ;;  %v2136_v63 = vmul.f32 %v4954_v23, %v5166_v7  ;;  %v927_v12 = vadd.s32 264, %v3770_v27 }
 0x1c8   : > { %v2102_v59 = vadd.f32 %v2070_v51, %v2037_v35  ;;  %v2103_v47 = vadd.f32 %v2071_v32, %v2038_v3  ;;  %2476 = vmatmul.bf16.gmra.mxu3 %v2332_v58  ;;  %v5754_v33 = vrot.slane %v4971_v36, 1  ;;  %v5756_v55 = vrot.slane %v4868_v39, 1 }
 0x1c9   : > { %v2199_v43 = vadd.f32 %v2004_v34, %v1841_v15  ;;  %v2200_v44 = vadd.f32 %v2005_v19, %v1842_v46  ;;  %v1259_v54 = vand.u32 15, %v927_v12  ;;  %v1727_v6 = vmul.f32 %v3788_v40, %v4920_v1  ;;  %v5757_v46 = vld [vmem:[#allocation72_spill] sm:$0xff] }
 0x1ca   : > { %v1553_v22 = vsel %vm1551_vm3, %v5754_v33, %v5753_v30  ;;  %v5755_v0 = vmov %v5754_v33  ;;  %v2167_v41 = vadd.f32 %v2135_v31, %v2102_v59  ;;  %v2168_v29 = vadd.f32 %v2136_v63, %v2103_v47  ;;  %v2989_v12 = vld [vmem:[%s3743_s23] sm:$0xff] }
 0x1cb   : > { %v5207_v25 = vsel %vm1551_vm3, %v5756_v55, %v5755_v0  ;;  %v1728_v15 = vmul.f32 %v3788_v40, %v4878_v21  ;;  %v1825_v16 = vmul.f32 %v3798_v50, %v4912_v37  ;;  %v1826_v36 = vmul.f32 %v3798_v50, %v4924_v52  ;;  %v5758_v37 = vld [vmem:[#allocation48_spill] sm:$0xff]  ;;  %851 = vmatmul.bf16.gmra.mxu2 %v2989_v12  ;;  %v5766_v12 = vld [vmem:[#allocation38_spill] sm:$0xff] }
 0x1cc   : > { %v1890_v39 = vmul.f32 %v3825_v2, %v5093_v49  ;;  %v2231_v13 = vadd.f32 %v2199_v43, %v2167_v41  ;;  %v2232_v20 = vadd.f32 %v2200_v44, %v2168_v29  ;;  %vm1331_vm3 = vcmp.ne.s32.totalorder %v1259_v54, 15  ;;  %v5238_v43 = vpop.f32.mrf.mxu1  ;;  %v5759_v33 = vld [vmem:[#allocation60_spill] sm:$0xff] }
 0x1cd   : > { %v1792_v61 = vadd.f32 %v5757_v46, %v1727_v6  ;;  %v5220_v42 = vsel %vm1331_vm3, %v1553_v22, 0.0  ;;  %v1793_v1 = vadd.f32 %v4604_v62, %v1728_v15  ;;  %v1891_v21 = vmul.f32 %v3825_v2, %v5067_v57 }
 0x1ce   : > { %v1955_v35 = vadd.f32 %v5758_v37, %v1890_v39  ;;  %v2267_v52 = vadd.f32 %v5009_v48, %v2231_v13  ;;  %v2268_v3 = vadd.f32 %v5009_v48, %v2232_v20  ;;  %v1988_v32 = vmul.f32 %v3831_v4, %v5087_v18  ;;  %v5761_v20 = vld [vmem:[#allocation51_spill] sm:$0xff] }
 0x1cf   : > { %v1857_v51 = vadd.f32 %v1825_v16, %v1792_v61  ;;  %v1858_v58 = vadd.f32 %v1826_v36, %v1793_v1  ;;  %v1956_v34 = vadd.f32 %v4818_v60, %v1891_v21  ;;  %v1989_v19 = vmul.f32 %v3831_v4, %v5095_v28  ;;  %v5760_v36 = vld [vmem:[#allocation50_spill] sm:$0xff]  ;;  %v5762_v21 = vld [vmem:[#allocation33_spill] sm:$0xff] }
 0x1d0   : > { %v2053_v62 = vmul.f32 %v3833_v5, %v4916_v9  ;;  %v2299_v31 = vmax.f32 %v2267_v52, 0.0  ;;  %v2300_v59 = vmax.f32 %v2268_v3, 0.0  ;;  %v2020_v47 = vadd.f32 %v1988_v32, %v1955_v35  ;;  %v5763_v3 = vld [vmem:[#allocation36_spill] sm:$0xff]  ;;  %v5764_v32 = vld [vmem:[#allocation39_spill] sm:$0xff] }
 0x1d1   : > { %v2054_v63 = vmul.f32 %v3833_v5, %v4996_v10  ;;  %v2021_v44 = vadd.f32 %v1989_v19, %v1956_v34  ;;  %v2151_v60 = vmul.f32 %v4954_v23, %v5207_v25  ;;  %v2152_v0 = vmul.f32 %v4954_v23, %v5220_v42 }
 0x1d2   : > { %v2118_v22 = vadd.f32 %v5759_v33, %v2053_v62  ;;  %v2325_v55 = vpack.c.bf16 %v2300_v59, %v2299_v31  ;;  %v2215_v41 = vadd.f32 %v2020_v47, %v1857_v51  ;;  %v1713_v29 = vmul.f32 %v3788_v40, %v4998_v8  ;;  %v5765_v62 = vld [vmem:[#allocation40_spill] sm:$0xff]  ;;  %v5767_v33 = vld [vmem:[#allocation41_spill] sm:$0xff] }
 0x1d3   : > { %v2119_v9 = vadd.f32 %v4985_v17, %v2054_v63  ;;  %v2216_v54 = vadd.f32 %v2021_v44, %v1858_v58  ;;  %v1714_v6 = vmul.f32 %v3788_v40, %v4969_v26  ;;  %v1811_v15 = vmul.f32 %v3798_v50, %v5021_v24 }
 0x1d4   : > { %v2183_v10 = vadd.f32 %v2151_v60, %v2118_v22  ;;  %2441 = vmatmul.bf16.gmra.mxu1 %v2325_v55  ;;  %v1778_v39 = vadd.f32 %v5760_v36, %v1713_v29  ;;  %v1812_v17 = vmul.f32 %v3798_v50, %v5023_v56  ;;  %v1876_v13 = vmul.f32 %v3825_v2, %v5161_v45  ;;  %v5768_v55 = vld [vmem:[#allocation47_spill] sm:$0xff]  ;;  %v5280_v29 = vpop.f32.mrf.mxu1 }
 0x1d5   : > { %v2184_v16 = vadd.f32 %v2152_v0, %v2119_v9  ;;  %v1779_v46 = vadd.f32 %v5761_v20, %v1714_v6  ;;  %v1877_v61 = vmul.f32 %v3825_v2, %v5135_v38  ;;  %v1974_v26 = vmul.f32 %v3831_v4, %v5155_v14 }
 0x1d6   : > { %v2247_v8 = vadd.f32 %v2215_v41, %v2183_v10  ;;  %v1843_v1 = vadd.f32 %v1811_v15, %v1778_v39  ;;  %v1941_v37 = vadd.f32 %v5762_v21, %v1876_v13  ;;  %v1975_v35 = vmul.f32 %v3831_v4, %v5166_v7 }
 0x1d7   : > { %v2248_v24 = vadd.f32 %v2216_v54, %v2184_v16  ;;  %v1844_v52 = vadd.f32 %v1812_v17, %v1779_v46  ;;  %v1942_v51 = vadd.f32 %v5763_v3, %v1877_v61  ;;  %v2039_v58 = vmul.f32 %v3833_v5, %v5764_v32  ;;  %v5769_v61 = vld [vmem:[#allocation54_spill] sm:$0xff] }
 0x1d8   : > { %v2283_v56 = vadd.f32 %v5009_v48, %v2247_v8  ;;  %v2006_v19 = vadd.f32 %v1974_v26, %v1941_v37  ;;  %v2040_v31 = vmul.f32 %v3833_v5, %v5765_v62  ;;  %v2072_v59 = vmul.f32 %v3803_v53, %v5746_v11  ;;  %v5773_v37 = vld [vmem:[#allocation53_spill] sm:$0xff] }
 0x1d9   : > { %v2284_v34 = vadd.f32 %v5009_v48, %v2248_v24  ;;  %v2007_v63 = vadd.f32 %v1975_v35, %v1942_v51  ;;  %v2073_v44 = vmul.f32 %v3803_v53, %v5766_v12  ;;  %v2137_v22 = vmul.f32 %v4954_v23, %v5767_v33  ;;  %v5770_v24 = vld [vmem:[#allocation56_spill] sm:$0xff] }
 0x1da   : > { %v2315_v47 = vmax.f32 %v2283_v56, 0.0  ;;  %v2104_v0 = vadd.f32 %v2072_v59, %v2039_v58  ;;  %v2138_v9 = vmul.f32 %v4954_v23, %v5768_v55  ;;  %v2201_v41 = vadd.f32 %v2006_v19, %v1843_v1  ;;  %v5774_v58 = vld [vmem:[#allocation49_spill] sm:$0xff]  ;;  %v5775_v59 = vld [vmem:[#allocation27_spill] sm:$0xff] }
 0x1db   : > { %v2316_v60 = vmax.f32 %v2284_v34, 0.0  ;;  %v2105_v10 = vadd.f32 %v2073_v44, %v2040_v31  ;;  %v2202_v54 = vadd.f32 %v2007_v63, %v1844_v52  ;;  %v928_v11 = vadd.s32 272, %v3770_v27  ;;  %v5319_v44 = vld [vmem:[%s3737_s22] sm:$0xff]  }
 0x1dc   : > { %v929_v6 = vadd.s32 280, %v3770_v27  ;;  %v2169_v16 = vadd.f32 %v2137_v22, %v2104_v0  ;;  %v1729_v36 = vmul.f32 %v3788_v40, %v5093_v49  ;;  %v1730_v39 = vmul.f32 %v3788_v40, %v5067_v57  ;;  %v2417_v22 = vpop.f32.mrf.mxu1  ;;  %v5776_v0 = vld [vmem:[#allocation58_spill] sm:$0xff] }
 0x1dd   : > { %v2333_v15 = vpack.c.bf16 %v2316_v60, %v2315_v47  ;;  %v2170_v17 = vadd.f32 %v2138_v9, %v2105_v10  ;;  %v1260_v13 = vand.u32 15, %v928_v11  ;;  %v1827_v20 = vmul.f32 %v3798_v50, %v5087_v18 }
 0x1de   : > { %v1261_v8 = vand.u32 15, %v929_v6  ;;  %v2233_v46 = vadd.f32 %v2201_v41, %v2169_v16  ;;  %v1794_v26 = vadd.f32 %v5769_v61, %v1729_v36  ;;  %v1795_v27 = vadd.f32 %v5770_v24, %v1730_v39 }
 0x1df   : > { %2481 = vmatmul.bf16.gmra.mxu3 %v2333_v15  ;;  %v1828_v1 = vmul.f32 %v3798_v50, %v5095_v28  ;;  %v2234_v21 = vadd.f32 %v2202_v54, %v2170_v17  ;;  %vm1296_vm6 = vcmp.ne.s32.totalorder %v1260_v13, 0  ;;  %v1990_v49 = vmul.f32 %v3831_v4, %v5207_v25  ;;  %v5308_v28 = vld [vmem:[%s5480_s8] ss:$0 sm:$0xff]  ;;  %v2457_v15 = vpop.f32.mrf.mxu3 }
 0x1e0   : > { %vm5294_vm7 = vcmp.ne.s32.totalorder %v1261_v8, 15  ;;  %v2269_v18 = vadd.f32 %v5009_v48, %v2233_v46  ;;  %v1513_v35 = vsel %vm1296_vm6, %v5773_v37, 0.0  ;;  %v1859_v52 = vadd.f32 %v1827_v20, %v1794_v26  ;;  %v5777_v13 = vld [vmem:[#allocation29_spill] sm:$0xff]  ;;  %v5778_v26 = vld [vmem:[#allocation32_spill] sm:$0xff]  ;;  %v5780_v37 = vld [vmem:[#allocation35_spill] sm:$0xff] }
 0x1e1   : > { %v1695_v56 = vsel %vm5294_vm7, %v5753_v30, 0.0  ;;  %v2270_v3 = vadd.f32 %v5009_v48, %v2234_v21  ;;  %v1860_v51 = vadd.f32 %v1828_v1, %v1795_v27  ;;  %v1991_v25 = vmul.f32 %v3831_v4, %v5220_v42 }
 0x1e2   : > { %v2022_v34 = vadd.f32 %v1990_v49, %v5774_v58  ;;  %v2301_v19 = vmax.f32 %v2269_v18, 0.0  ;;  %v2055_v31 = vmul.f32 %v3833_v5, %v1513_v35  ;;  %v2056_v47 = vmul.f32 %v3833_v5, %v5775_v59  ;;  %v5784_v58 = vld [vmem:[#allocation43_spill] sm:$0xff]  ;;  %v5785_v59 = vld [vmem:[#allocation46_spill] sm:$0xff] }
 0x1e3   : > { %v2088_v63 = vmul.f32 0.0, %v3803_v53  ;;  %v2302_v60 = vmax.f32 %v2270_v3, 0.0  ;;  %v2023_v9 = vadd.f32 %v1991_v25, %v5776_v0  ;;  %v2153_v41 = vmul.f32 %v4954_v23, %v5753_v30 }
 0x1e4   : > { %v2154_v42 = vmul.f32 %v4954_v23, %v1695_v56  ;;  %v2217_v11 = vadd.f32 %v2022_v34, %v1859_v52  ;;  %v2413_v6 = vadd.f32 %v5308_v28, %v5238_v43  ;;  %v2492_v39 = vunpack.c.l.bf16 %v5319_v44  ;;  %v5782_v52 = vld [vmem:[#allocation45_spill] sm:$0xff] }
 0x1e5   : > { %v2120_v10 = vadd.f32 %v2088_v63, %v2055_v31  ;;  %v2121_v54 = vadd.f32 %v2088_v63, %v2056_v47  ;;  %v2326_v16 = vpack.c.bf16 %v2302_v60, %v2301_v19  ;;  %v2218_v36 = vadd.f32 %v2023_v9, %v1860_v51  ;;  %v5783_v51 = vld [vmem:[#allocation42_spill] sm:$0xff]  ;;  %v548_v19 = vld [vmem:[%s3737_s22 + $0x8] sm:$0xff]  }
 0x1e6   : > { %v1715_v17 = vmul.f32 %v3788_v40, %v5161_v45  ;;  %v1912_v8 = vmul.f32 %v5777_v13, %v5766_v12  ;;  %v1716_v46 = vmul.f32 %v3788_v40, %v5135_v38  ;;  %v2524_v61 = vadd.f32 %v2492_v39, %v2413_v6  ;;  %v5779_v40 = vld [vmem:[#allocation37_spill] sm:$0xff]  ;;  %v5786_v63 = vld [vmem:[#allocation52_spill] sm:$0xff] }
 0x1e7   : > { %v2185_v30 = vadd.f32 %v2153_v41, %v2120_v10  ;;  %v2186_v20 = vadd.f32 %v2154_v42, %v2121_v54  ;;  %2446 = vmatmul.bf16.gmra.mxu1 %v2326_v16  ;;  %v1813_v24 = vmul.f32 %v3798_v50, %v5155_v14  ;;  %v1878_v27 = vmul.f32 %v3825_v2, %v5764_v32  ;;  %v2459_v10 = vpop.f32.mrf.mxu3  ;;  %v564_v16 = vld [vmem:[%s3737_s22 + $0x48] sm:$0xff]  }
 0x1e8   : > { %v1780_v43 = vadd.f32 %v5778_v26, %v1715_v17  ;;  %v1814_v12 = vmul.f32 %v3798_v50, %v5166_v7  ;;  %v1879_v21 = vmul.f32 %v3825_v2, %v5765_v62  ;;  %v1976_v49 = vmul.f32 %v3831_v4, %v5767_v33  ;;  %v2419_v7 = vpop.f32.mrf.mxu1  ;;  %v5781_v2 = vld [vmem:[#allocation44_spill] sm:$0xff] }
 0x1e9   : > { %v2249_v1 = vadd.f32 %v2217_v11, %v2185_v30  ;;  %v2250_v45 = vadd.f32 %v2218_v36, %v2186_v20  ;;  %v1943_v38 = vadd.f32 %v5779_v40, %v1878_v27  ;;  %v1977_v14 = vmul.f32 %v3831_v4, %v5768_v55 }
 0x1ea   : > { %v1845_v57 = vadd.f32 %v1813_v24, %v1780_v43  ;;  %v1781_v35 = vadd.f32 %v5780_v37, %v1716_v46  ;;  %v1944_v50 = vadd.f32 %v1912_v8, %v1879_v21  ;;  %v2041_v62 = vmul.f32 %v3833_v5, %v5781_v2 }
 0x1eb   : > { %v2285_v32 = vadd.f32 %v5009_v48, %v2249_v1  ;;  %v2286_v18 = vadd.f32 %v5009_v48, %v2250_v45  ;;  %v2008_v56 = vadd.f32 %v1976_v49, %v1943_v38  ;;  %v2042_v3 = vmul.f32 %v3833_v5, %v5782_v52 }
 0x1ec   : > { %v2074_v33 = vmul.f32 %v3803_v53, %v5783_v51  ;;  %v2009_v55 = vadd.f32 %v1977_v14, %v1944_v50  ;;  %v2075_v34 = vmul.f32 %v3803_v53, %v5784_v58  ;;  %v2139_v47 = vmul.f32 %v4954_v23, %v5785_v59  ;;  %v552_v58 = vld [vmem:[%s3737_s22 + $0x18] sm:$0xff]  }
 0x1ed   : > { %v2317_v25 = vmax.f32 %v2285_v32, 0.0  ;;  %v2318_v4 = vmax.f32 %v2286_v18, 0.0  ;;  %v2140_v60 = vmul.f32 %v4954_v23, %v5786_v63  ;;  %v2203_v0 = vadd.f32 %v2008_v56, %v1845_v57  ;;  %v550_v57 = vld [vmem:[%s3737_s22 + $0x10] sm:$0xff]  }
 0x1ee   : > { %v2106_v31 = vadd.f32 %v2074_v33, %v2041_v62  ;;  %v1846_v9 = vadd.f32 %v1814_v12, %v1781_v35  ;;  %v2107_v41 = vadd.f32 %v2075_v34, %v2042_v3  ;;  %v2415_v42 = vadd.f32 %v5308_v28, %v5280_v29  ;;  %v566_v35 = vld [vmem:[%s3737_s22 + $0x50] sm:$0xff]  }
 0x1ef   : > { %v2334_v5 = vpack.c.bf16 %v2318_v4, %v2317_v25  ;;  %v2493_v11 = vunpack.c.h.bf16 %v5319_v44  ;;  %v2418_v53 = vadd.f32 %v5308_v28, %v2417_v22  ;;  %v2494_v6 = vunpack.c.l.bf16 %v548_v19  ;;  %v2462_v49 = vpop.f32.mrf.mxu3 }
 0x1f0   : > { %v2171_v54 = vadd.f32 %v2139_v47, %v2106_v31  ;;  %v2172_v36 = vadd.f32 %v2140_v60, %v2107_v41  ;;  %v2204_v39 = vadd.f32 %v2009_v55, %v1846_v9  ;;  %v2420_v23 = vadd.f32 %v5308_v28, %v2419_v7  ;;  %v2422_v26 = vpop.f32.mrf.mxu1  ;;  %v568_v9 = vld [vmem:[%s3737_s22 + $0x58] sm:$0xff]  }
 0x1f1   : > { %2486 = vmatmul.bf16.gmra.mxu3 %v2334_v5  ;;  %v2495_v17 = vunpack.c.h.bf16 %v548_v19  ;;  %v2525_v8 = vadd.f32 %v2493_v11, %v2415_v42  ;;  %v2526_v30 = vadd.f32 %v2494_v6, %v2418_v53  ;;  %v2458_v29 = vadd.f32 %v5308_v28, %v2457_v15 }
 0x1f2   : > { %v2235_v13 = vadd.f32 %v2203_v0, %v2171_v54  ;;  %v2236_v20 = vadd.f32 %v2204_v39, %v2172_v36  ;;  %v2510_v44 = vunpack.c.l.bf16 %v564_v16  ;;  %v2460_v22 = vadd.f32 %v5308_v28, %v2459_v10 }
 0x1f3   : > { %v2527_v46 = vadd.f32 %v2495_v17, %v2420_v23  ;;  %v3010_v24 = vpack.c.bf16 %v2525_v8, %v2524_v61  ;;  %v2511_v45 = vunpack.c.h.bf16 %v564_v16  ;;  %v2496_v14 = vunpack.c.l.bf16 %v550_v57  ;;  %v554_v16 = vld [vmem:[%s3737_s22 + $0x20] sm:$0xff]  }
 0x1f4   : > { %v2271_v43 = vadd.f32 %v5009_v48, %v2235_v13  ;;  %v2272_v27 = vadd.f32 %v5009_v48, %v2236_v20  ;;  %v2542_v21 = vadd.f32 %v2510_v44, %v2458_v29  ;;  %v2423_v48 = vadd.f32 %v5308_v28, %v2422_v26  ;;  %v570_v26 = vld [vmem:[%s3737_s22 + $0x60] sm:$0xff]  }
 0x1f5   : > { %v3015_v1 = vpack.c.bf16 %v2527_v46, %v2526_v30  ;;  %3011 = vst [vmem:[%s5376_s3] sm:$0xff] %v3010_v24   ;;  %v2543_v40 = vadd.f32 %v2511_v45, %v2460_v22  ;;  %v2497_v32 = vunpack.c.h.bf16 %v550_v57  ;;  %v2463_v2 = vadd.f32 %v5308_v28, %v2462_v49 }
 0x1f6   : > { %v2303_v12 = vmax.f32 %v2271_v43, 0.0  ;;  %v2304_v15 = vmax.f32 %v2272_v27, 0.0  ;;  %v2528_v50 = vadd.f32 %v2496_v14, %v2423_v48  ;;  %v2512_v62 = vunpack.c.l.bf16 %v566_v35 }
 0x1f7   : > { %3088 = vst [vmem:[%s5376_s3 + $0x8] sm:$0xff] %v3015_v1   ;;  %v3055_v61 = vpack.c.bf16 %v2543_v40, %v2542_v21  ;;  %v2513_v52 = vunpack.c.h.bf16 %v566_v35  ;;  %v2464_v3 = vpop.f32.mrf.mxu3  ;;  %v2498_v19 = vunpack.c.l.bf16 %v552_v58  ;;  %v2499_v31 = vunpack.c.h.bf16 %v552_v58  ;;  %v556_v21 = vld [vmem:[%s3737_s22 + $0x28] sm:$0xff]  }
 0x1f8   : > { %v2327_v38 = vpack.c.bf16 %v2304_v15, %v2303_v12  ;;  %v2424_v18 = vpop.f32.mrf.mxu1  ;;  %v2465_v51 = vadd.f32 %v5308_v28, %v2464_v3  ;;  %v2544_v25 = vadd.f32 %v2512_v62, %v2463_v2  ;;  %v2514_v42 = vunpack.c.l.bf16 %v568_v9  ;;  %v572_v35 = vld [vmem:[%s3737_s22 + $0x68] sm:$0xff]  }
 0x1f9   : > { %3096 = vst [vmem:[%s5376_s3 + $0x48] sm:$0xff] %v3055_v61   ;;  %v2425_v37 = vadd.f32 %v5308_v28, %v2424_v18  ;;  %v2515_v54 = vunpack.c.h.bf16 %v568_v9  ;;  %v2500_v17 = vunpack.c.l.bf16 %v554_v16  ;;  %v2501_v13 = vunpack.c.h.bf16 %v554_v16  ;;  %v574_v9 = vld [vmem:[%s3737_s22 + $0x70] sm:$0xff]  }
 0x1fa   : > { %2451 = vmatmul.bf16.gmra.mxu1 %v2327_v38  ;;  %v2545_v4 = vadd.f32 %v2513_v52, %v2465_v51  ;;  %v2516_v43 = vunpack.c.l.bf16 %v570_v26  ;;  %v2517_v24 = vunpack.c.h.bf16 %v570_v26  ;;  %v2502_v38 = vunpack.c.l.bf16 %v556_v21  ;;  %v558_v52 = vld [vmem:[%s3737_s22 + $0x30] sm:$0xff]  }
 0x1fb   : > { %v2529_v7 = vadd.f32 %v2497_v32, %v2425_v37  ;;  %v2503_v61 = vunpack.c.h.bf16 %v556_v21  ;;  %v2519_v2 = vunpack.c.h.bf16 %v572_v35  ;;  %v2505_v58 = vunpack.c.h.bf16 %v558_v52 }
 0x1fc   : > { %v3060_v55 = vpack.c.bf16 %v2545_v4, %v2544_v25 }
 0x1fd   : > { %v3020_v56 = vpack.c.bf16 %v2529_v7, %v2528_v50 }
 0x1fe   : > { %3097 = vst [vmem:[%s5376_s3 + $0x50] sm:$0xff] %v3060_v55   ;;  %v2504_v55 = vunpack.c.l.bf16 %v558_v52 }
 0x1ff   : > { %3089 = vst [vmem:[%s5376_s3 + $0x10] sm:$0xff] %v3020_v56   ;;  %v2518_v56 = vunpack.c.l.bf16 %v572_v35 }
 0x200   : > { %v2427_v33 = vpop.f32.mrf.mxu1 }
 0x201   : > { %v2428_v34 = vadd.f32 %v5308_v28, %v2427_v33 }
 0x203   : > { %v2530_v63 = vadd.f32 %v2498_v19, %v2428_v34 }
 0x208   : > { %v2429_v59 = vpop.f32.mrf.mxu1 }
 0x209   : > { %v2430_v47 = vadd.f32 %v5308_v28, %v2429_v59 }
 0x20b   : > { %v2531_v60 = vadd.f32 %v2499_v31, %v2430_v47 }
 0x20d   : > { %v3025_v0 = vpack.c.bf16 %v2531_v60, %v2530_v63  ;;  %v2467_v5 = vpop.f32.mrf.mxu3 }
 0x20e   : > { %v2468_v41 = vadd.f32 %v5308_v28, %v2467_v5 }
 0x20f   : > { %3090 = vst [vmem:[%s5376_s3 + $0x18] sm:$0xff] %v3025_v0  }
 0x210   : > { %v2546_v6 = vadd.f32 %v2514_v42, %v2468_v41  ;;  %v2520_v42 = vunpack.c.l.bf16 %v574_v9 }
 0x215   : > { %v2469_v11 = vpop.f32.mrf.mxu3 }
 0x216   : > { %v2432_v10 = vpop.f32.mrf.mxu1  ;;  %v2470_v53 = vadd.f32 %v5308_v28, %v2469_v11 }
 0x217   : > { %v2433_v23 = vadd.f32 %v5308_v28, %v2432_v10  ;;  %v560_v10 = vld [vmem:[%s3737_s22 + $0x38] sm:$0xff]  }
 0x218   : > { %v2547_v36 = vadd.f32 %v2515_v54, %v2470_v53  ;;  %v2521_v54 = vunpack.c.h.bf16 %v574_v9  ;;  %v2506_v16 = vunpack.c.l.bf16 %v560_v10 }
 0x219   : > { %v2532_v29 = vadd.f32 %v2500_v17, %v2433_v23 }
 0x21a   : > { %v3065_v39 = vpack.c.bf16 %v2547_v36, %v2546_v6  ;;  %v2507_v36 = vunpack.c.h.bf16 %v560_v10 }
 0x21c   : > { %3098 = vst [vmem:[%s5376_s3 + $0x58] sm:$0xff] %v3065_v39  }
 0x21e   : > { %v2434_v8 = vpop.f32.mrf.mxu1 }
 0x21f   : > { %v2435_v30 = vadd.f32 %v5308_v28, %v2434_v8 }
 0x221   : > { %v2533_v20 = vadd.f32 %v2501_v13, %v2435_v30 }
 0x223   : > { %v3030_v46 = vpack.c.bf16 %v2533_v20, %v2532_v29 }
 0x225   : > { %3091 = vst [vmem:[%s5376_s3 + $0x20] sm:$0xff] %v3030_v46  }
 0x22d   : > { %v2472_v44 = vpop.f32.mrf.mxu3 }
 0x22e   : > { %v2473_v22 = vadd.f32 %v5308_v28, %v2472_v44  ;;  %v576_v44 = vld [vmem:[%s3737_s22 + $0x78] sm:$0xff]  }
 0x230   : > { %v2548_v12 = vadd.f32 %v2516_v43, %v2473_v22  ;;  %v2522_v43 = vunpack.c.l.bf16 %v576_v44 }
 0x235   : > { %v2474_v1 = vpop.f32.mrf.mxu3 }
 0x236   : > { %v2475_v45 = vadd.f32 %v5308_v28, %v2474_v1 }
 0x237   : > { %v2437_v27 = vpop.f32.mrf.mxu1 }
 0x238   : > { %v2549_v15 = vadd.f32 %v2517_v24, %v2475_v45  ;;  %v2438_v40 = vadd.f32 %v5308_v28, %v2437_v27  ;;  %v562_v24 = vld [vmem:[%s3737_s22 + $0x40] sm:$0xff]   ;;  %v2523_v27 = vunpack.c.h.bf16 %v576_v44  ;;  %s3430_s22 = sshra.s32 %s2638_s12, 4  ;;  %s3431_s22 = int_to_ptr.hbm [resolvable:$true] %s3430_s22 }
 0x239   : > { %s3432_s23 = scalar_lea.hbm %s3431_s22, 128  ;;  %p3437_p8 = scmp.lt.s32.totalorder %s3431_s22, %s5788_s7 }
 0x23a   : > { %v3070_v57 = vpack.c.bf16 %v2549_v15, %v2548_v12  ;;  %v2534_v14 = vadd.f32 %v2502_v38, %v2438_v40  ;;  %v2508_v12 = vunpack.c.l.bf16 %v562_v24  ;;  %v2509_v40 = vunpack.c.h.bf16 %v562_v24  ;;  %p3433_p1 = scmp.ne.s32.totalorder %s3431_s22, %s3432_s23  ;;  %p3438_p10 = scmp.lt.s32.totalorder %s3436_s19, %s3432_s23 }
 0x23c   : > { %3099 = vst [vmem:[%s5376_s3 + $0x60] sm:$0xff] %v3070_v57   ;;  %p3434_p2 = pnand %p3433_p1, %p3652_p5  ;;  %p3439_p11 = por %p3438_p10, %p3437_p8 }
 0x23e   : > { %p3435_p4 = pneg %p3434_p2 }
 0x23f   : > { %v2439_v49 = vpop.f32.mrf.mxu1 }
 0x240   : > { %v2440_v48 = vadd.f32 %v5308_v28, %v2439_v49  ;;  %p3440_p12 = pnand %p3439_p11, %p3435_p4 }
 0x242   : > { %v2535_v32 = vadd.f32 %v2503_v61, %v2440_v48 }
 0x244   : > { %v3035_v18 = vpack.c.bf16 %v2535_v32, %v2534_v14 }
 0x246   : > { %3092 = vst [vmem:[%s5376_s3 + $0x28] sm:$0xff] %v3035_v18  }
 0x24b   : > { %v2477_v37 = vpop.f32.mrf.mxu3 }
 0x24c   : > { %v2478_v7 = vadd.f32 %v5308_v28, %v2477_v37 }
 0x24e   : > { %v852_v51 = vpop.f32.mrf.mxu2  ;;  %v2550_v33 = vadd.f32 %v2518_v56, %v2478_v7 }
 0x251   : > { %v2442_v50 = vpop.f32.mrf.mxu1 }
 0x252   : > { %v2443_v4 = vadd.f32 %v5308_v28, %v2442_v50 }
 0x253   : > { %v2479_v62 = vpop.f32.mrf.mxu3 }
 0x254   : > { %v2480_v3 = vadd.f32 %v5308_v28, %v2479_v62  ;;  %v2536_v59 = vadd.f32 %v2504_v55, %v2443_v4 }
 0x256   : > { %v2551_v25 = vadd.f32 %v2519_v2, %v2480_v3  ;;  %v854_v63 = vpop.f32.mrf.mxu2 }
 0x258   : > { %v3075_v34 = vpack.c.bf16 %v2551_v25, %v2550_v33 }
 0x259   : > { %v2444_v19 = vpop.f32.mrf.mxu1 }
 0x25a   : > { %v2445_v31 = vadd.f32 %v5308_v28, %v2444_v19  ;;  %3100 = vst [vmem:[%s5376_s3 + $0x68] sm:$0xff] %v3075_v34  }
 0x25c   : > { %v2537_v47 = vadd.f32 %v2505_v58, %v2445_v31 }
 0x25e   : > { %v3040_v60 = vpack.c.bf16 %v2537_v47, %v2536_v59 }
 0x260   : > { %3093 = vst [vmem:[%s5376_s3 + $0x30] sm:$0xff] %v3040_v60  }
 0x262   : > { %v2482_v0 = vpop.f32.mrf.mxu3 }
 0x263   : > { %v2483_v41 = vadd.f32 %v5308_v28, %v2482_v0 }
 0x264   : > { %v2447_v5 = vpop.f32.mrf.mxu1 }
 0x265   : > { %v2448_v6 = vadd.f32 %v5308_v28, %v2447_v5  ;;  %v2552_v39 = vadd.f32 %v2520_v42, %v2483_v41 }
 0x267   : > { %v2538_v30 = vadd.f32 %v2506_v16, %v2448_v6 }
 0x26a   : > { %v2484_v11 = vpop.f32.mrf.mxu3 }
 0x26b   : > { %v2485_v53 = vadd.f32 %v5308_v28, %v2484_v11 }
 0x26c   : > { %v2449_v17 = vpop.f32.mrf.mxu1 }
 0x26d   : > { %v2553_v23 = vadd.f32 %v2521_v54, %v2485_v53  ;;  %v2450_v13 = vadd.f32 %v5308_v28, %v2449_v17 }
 0x26f   : > { %v3080_v8 = vpack.c.bf16 %v2553_v23, %v2552_v39  ;;  %v2539_v29 = vadd.f32 %v2507_v36, %v2450_v13 }
 0x271   : > { %3101 = vst [vmem:[%s5376_s3 + $0x70] sm:$0xff] %v3080_v8   ;;  %v3045_v20 = vpack.c.bf16 %v2539_v29, %v2538_v30 }
 0x273   : > { %3094 = vst [vmem:[%s5376_s3 + $0x38] sm:$0xff] %v3045_v20  }
 0x274   : > { %v2487_v46 = vpop.f32.mrf.mxu3 }
 0x275   : > { %v2488_v22 = vadd.f32 %v5308_v28, %v2487_v46 }
 0x277   : > { %v2452_v26 = vpop.f32.mrf.mxu1  ;;  %v2554_v15 = vadd.f32 %v2522_v43, %v2488_v22 }
 0x278   : > { %v2453_v21 = vadd.f32 %v5308_v28, %v2452_v26 }
 0x27a   : > { %v2540_v48 = vadd.f32 %v2508_v12, %v2453_v21 }
 0x27c   : > { %v2489_v1 = vpop.f32.mrf.mxu3 }
 0x27d   : > { %v2490_v45 = vadd.f32 %v5308_v28, %v2489_v1 }
 0x27f   : > { %v2555_v57 = vadd.f32 %v2523_v27, %v2490_v45  ;;  %v2454_v38 = vpop.f32.mrf.mxu1 }
 0x280   : > { %v2455_v49 = vadd.f32 %v5308_v28, %v2454_v38 }
 0x281   : > { %v3085_v61 = vpack.c.bf16 %v2555_v57, %v2554_v15 }
 0x282   : > { %v2541_v14 = vadd.f32 %v2509_v40, %v2455_v49 }
 0x283   : > { %3102 = vst [vmem:[%s5376_s3 + $0x78] sm:$0xff] %v3085_v61  }
 0x284   : > { %v3050_v32 = vpack.c.bf16 %v2541_v14, %v2540_v48 }
 0x286   : > { %3095 = vst [vmem:[%s5376_s3 + $0x40] sm:$0xff] %v3050_v32  }
 0x287   : > { %3443 = shalt.err (!%p3440_p12)
}
 0x288   : > { %s3520_s5 = smov 64   ;;  %s3521_s27 = smov 4  }
 0x289   : > { %3137 = dma.vmem_to_hbm [thread:$0]  (%p3652_p5), %s2636_s9, 2048, %s2638_s12, %s2621_s13, %s3520_s5, %s3520_s5, %s3521_s27  }
 0x28a PF: > { %s5790_s28 = sld [smem:[#allocation19_spill]]  ;;  %p5792_p13 = scmp.ge.s32.totalorder %s3510_s14, 2 }
 0x28c   : > { %p3160_p0 = pnand %p5792_p13, %p3617_p6 }
 0x28e   : > { %p3161_p3 = pneg %p3160_p0 }
 0x290   : > { %s2652_s11 = sand.u32 1, %s5790_s28  }
 0x291   : > { %s2653_s25 = scalar_lea.sflag [#allocation4], %s2652_s11 }
 0x292   : > { %3485 = dma.done.wait (%p3161_p3), %s2653_s25, 2048  }
 0x293   : > { %3487 = vsyncadd (%p3161_p3), %s2653_s25, 4294965248  ;;  %s30_s14 = sadd.s32 1, %s3510_s14   ;;  %s5793_s3 = sld [smem:[#allocation20_spill]] }
 0x294   : > { %p27_p7 = scmp.ge.s32.totalorder %s30_s14, 4   ;;  %s5794_s11 = sld [smem:[#allocation26_spill]] }
 0x295   : > { %s5795_s12 = sld [smem:[#allocation22_spill]]  ;;  %s5797_s30 = smov %s3494_s10 }
 0x296   : > { %s5796_s13 = sld [smem:[#allocation24_spill]]  ;;  %29 = sbr.rel (!%p27_p7) target bundleno = 16 (0x10), region = 137 }
 0x299   : > { %s5798_s10 = smov %s5793_s3 }
 0x29b   :  { %2659 = vsyncpa [#allocation3], 1 }
 0x29c   :  { %2661 = vsyncpa [#allocation3 + $0x1], 1 }
 0x29d   :  { %2662 = vsyncpa [#allocation6], 1 }
 0x29e   :  { %2664 = vsyncpa [#allocation6 + $0x1], 1 }
 0x29f   :  { %2665 = vsyncpa [#allocation9], 1 }
 0x2a0   :  { %2666 = vsyncpa [#allocation12], 1 }
 0x2a1   :  { %2667 = vsyncpa [#allocation4], 1 }
 0x2a2   :  { %2669 = vsyncpa [#allocation4 + $0x1], 1 }

</bundles_post_ra>
